<compile_context>
chip_gen: v6e
topology: v6e:2x2x1
jax: 0.10.0
libtpu: 0.0.40
codegen_flags: <defaults>
</compile_context>

<pallas_src>
import functools

import jax
import jax.numpy as jnp
from jax.experimental import pallas as pl
from jax.experimental.pallas import tpu as pltpu


# ----------------------------------------------------------------------------
# Small helpers
# ----------------------------------------------------------------------------

def _layer_norm(x, w, b, eps=1e-5):
    mu = jnp.mean(x, axis=-1, keepdims=True)
    var = jnp.mean(jnp.square(x - mu), axis=-1, keepdims=True)
    return (x - mu) * jax.lax.rsqrt(var + eps) * w + b


def _gelu_exact(x):
    # nn.GELU() default is the exact erf formulation.
    return 0.5 * x * (1.0 + jax.lax.erf(x * 0.7071067811865476))


def _vmem_limit_bytes():
    """3/4 of physical VMEM when probeable; 48 MiB fallback (safe on v7x)."""
    try:
        info = pltpu.get_tpu_info()
        cap = getattr(info, "vmem_capacity_bytes", None)
        if cap:
            return int(cap) * 3 // 4
    except Exception:
        pass
    return 48 * 1024 * 1024


_BUFFERED_ONE_OK = None


def _single_buffer_weights_supported():
    """Probe once whether pipeline_mode=pl.Buffered(1) compiles on this JAX."""
    global _BUFFERED_ONE_OK
    if _BUFFERED_ONE_OK is None:
        try:
            def _probe_kernel(x_ref, w_ref, o_ref):
                o_ref[...] = x_ref[...] + w_ref[...]

            x = jnp.zeros((16, 128), jnp.float32)
            w = jnp.zeros((8, 128), jnp.float32)
            out = pl.pallas_call(
                _probe_kernel,
                out_shape=jax.ShapeDtypeStruct((16, 128), jnp.float32),
                grid=(2,),
                in_specs=[
                    pl.BlockSpec((8, 128), lambda i: (i, 0)),
                    pl.BlockSpec((8, 128), lambda i: (0, 0),
                                 pipeline_mode=pl.Buffered(1)),
                ],
                out_specs=pl.BlockSpec((8, 128), lambda i: (i, 0)),
            )(x, w)
            jax.block_until_ready(out)
            _BUFFERED_ONE_OK = True
        except Exception:
            _BUFFERED_ONE_OK = False
    return _BUFFERED_ONE_OK


def _resident_weight_spec(shape):
    """Constant-index (weight) BlockSpec, single-buffered when supported."""
    ndim = len(shape)
    index_map = lambda b, _n=ndim: (0,) * _n
    if _single_buffer_weights_supported():
        return pl.BlockSpec(shape, index_map, pipeline_mode=pl.Buffered(1))
    return pl.BlockSpec(shape, index_map)


def _choose_b_tile(n_batch, seq_len, max_rows=512, max_b=8):
    """Largest divisor of N (<= max_b) keeping B_TILE*L within max_rows."""
    best = 1
    for bt in range(1, min(n_batch, max_b) + 1):
        if n_batch % bt == 0 and bt * seq_len <= max_rows:
            best = bt
    return best


# ----------------------------------------------------------------------------
# Kernels: attention half-block and MLP half-block for B_TILE batch elements
# ----------------------------------------------------------------------------

def attn_block_kernel(x_ref, ln1w_ref, ln1b_ref, wqkv_ref, bqkv_ref,
                      wo_ref, bo_ref, o_ref, *, n_head, b_tile):
    B = b_tile
    _, L, E = x_ref.shape
    d_head = E // n_head

    x = x_ref[...].astype(jnp.float32).reshape(B * L, E)     # residual stream
    xn = _layer_norm(x, ln1w_ref[0], ln1b_ref[0])
    # 1/sqrt(d_head) is already folded into the q columns of wqkv/bqkv.
    qkv = jnp.dot(xn.astype(jnp.bfloat16), wqkv_ref[...],
                  preferred_element_type=jnp.float32) + bqkv_ref[0]   # (B*L,3E)

    ctx_rows = []
    for b in range(B):                                        # short unrolled loop
        rows = qkv[b * L:(b + 1) * L, :]                      # (L, 3E) static slice
        qh = jnp.transpose(rows[:, 0:E].reshape(L, n_head, d_head),
                           (1, 0, 2)).astype(jnp.bfloat16)    # (H, L, d)
        kh = jnp.transpose(rows[:, E:2 * E].reshape(L, n_head, d_head),
                           (1, 0, 2)).astype(jnp.bfloat16)
        vh = jnp.transpose(rows[:, 2 * E:3 * E].reshape(L, n_head, d_head),
                           (1, 0, 2)).astype(jnp.bfloat16)

        s = jnp.einsum('hqd,hkd->hqk', qh, kh,
                       preferred_element_type=jnp.float32)    # (H, L, L) f32
        s = s - jnp.max(s, axis=-1, keepdims=True)
        p = jnp.exp(s)
        denom = jnp.sum(p, axis=-1, keepdims=True)            # (H, L, 1)
        ctx = jnp.einsum('hqk,hkd->hqd', p.astype(jnp.bfloat16), vh,
                         preferred_element_type=jnp.float32)  # (H, L, d) f32
        # Normalize AFTER the PV matmul: O(H*L*d) multiplies, not O(H*L*L).
        ctx = ctx * pl.reciprocal(denom, approx=True)
        ctx_rows.append(jnp.transpose(ctx, (1, 0, 2)).reshape(L, E))

    ctx_all = ctx_rows[0] if B == 1 else jnp.concatenate(ctx_rows, axis=0)

    attn_out = jnp.dot(ctx_all.astype(jnp.bfloat16), wo_ref[...],
                       preferred_element_type=jnp.float32) + bo_ref[0]
    o_ref[...] = (x + attn_out).reshape(B, L, E).astype(o_ref.dtype)


def mlp_block_kernel(x_ref, ln2w_ref, ln2b_ref, w1_ref, b1_ref,
                     w2_ref, b2_ref, o_ref, *, b_tile):
    B = b_tile
    _, L, E = x_ref.shape

    x = x_ref[...].astype(jnp.float32).reshape(B * L, E)
    xn = _layer_norm(x, ln2w_ref[0], ln2b_ref[0])
    h1 = jnp.dot(xn.astype(jnp.bfloat16), w1_ref[...],
                 preferred_element_type=jnp.float32) + b1_ref[0]      # (B*L,4E)
    h1 = _gelu_exact(h1)
    h2 = jnp.dot(h1.astype(jnp.bfloat16), w2_ref[...],
                 preferred_element_type=jnp.float32) + b2_ref[0]
    o_ref[...] = (x + h2).reshape(B, L, E).astype(o_ref.dtype)


# ----------------------------------------------------------------------------
# Wrappers
# ----------------------------------------------------------------------------

def _half_block_call(kernel, x_nle, params, b_tile):
    N, L, E = x_nle.shape
    weight_specs = [_resident_weight_spec(p.shape) for p in params]
    return pl.pallas_call(
        kernel,
        out_shape=jax.ShapeDtypeStruct((N, L, E), x_nle.dtype),
        grid=(N // b_tile,),
        in_specs=[pl.BlockSpec((b_tile, L, E), lambda i: (i, 0, 0))] + weight_specs,
        out_specs=pl.BlockSpec((b_tile, L, E), lambda i: (i, 0, 0)),
        compiler_params=pltpu.CompilerParams(
            dimension_semantics=("parallel",),
            vmem_limit_bytes=_vmem_limit_bytes()),
    )(x_nle, *params)


def residual_attention_block(x_nle, layer_params, n_head, b_tile):
    """One ResidualAttentionBlock as two pallas_calls.  x_nle: (N, L, E)."""
    attn_params = layer_params[:6]
    mlp_params = layer_params[6:]
    x = _half_block_call(
        functools.partial(attn_block_kernel, n_head=n_head, b_tile=b_tile),
        x_nle, attn_params, b_tile)
    x = _half_block_call(
        functools.partial(mlp_block_kernel, b_tile=b_tile),
        x, mlp_params, b_tile)
    return x


def transformer_forward(x_lne, kernel_params, n_head, carry_dtype=jnp.bfloat16):
    """Transformer.forward.  x_lne: (L, N, E) as in the PyTorch module.

    The (L,N,E)<->(N,L,E) relayout happens only at model entry/exit (not per
    layer); the residual stream is carried between layers in `carry_dtype`
    (bf16 by default) to halve inter-layer HBM traffic.
    """
    L, N, E = x_lne.shape
    b_tile = _choose_b_tile(N, L)
    x = jnp.transpose(x_lne, (1, 0, 2)).astype(carry_dtype)   # (N, L, E)
    for layer_params in kernel_params:
        x = residual_attention_block(x, layer_params, n_head, b_tile)
    return jnp.transpose(x, (1, 0, 2)).astype(x_lne.dtype)    # back to (L, N, E)


# ----------------------------------------------------------------------------
# Parameters: PyTorch-layout init + conversion to kernel layout
# ----------------------------------------------------------------------------

def init_transformer_params(key, width, layers, mlp_ratio=4.0):
    """Deterministic synthetic parameters in PyTorch nn.Module shapes."""
    mlp_width = int(width * mlp_ratio)
    params = []
    for l in range(layers):
        keys = jax.random.split(jax.random.fold_in(key, l), 6)
        ln1_w = jnp.ones((width,), jnp.float32)
        ln1_b = jnp.zeros((width,), jnp.float32)
        wqkv = jax.random.normal(keys[0], (3 * width, width), jnp.float32) * 0.02
        bqkv = jax.random.normal(keys[1], (3 * width,), jnp.float32) * 0.02
        wo = jax.random.normal(keys[2], (width, width), jnp.float32) * 0.02
        bo = jax.random.normal(keys[3], (width,), jnp.float32) * 0.02
        ln2_w = jnp.ones((width,), jnp.float32)
        ln2_b = jnp.zeros((width,), jnp.float32)
        w1 = jax.random.normal(keys[4], (mlp_width, width), jnp.float32) * 0.02
        b1 = jnp.zeros((mlp_width,), jnp.float32)
        w2 = jax.random.normal(keys[5], (width, mlp_width), jnp.float32) * 0.02
        b2 = jnp.zeros((width,), jnp.float32)
        params.append((ln1_w, ln1_b, wqkv, bqkv, wo, bo,
                       ln2_w, ln2_b, w1, b1, w2, b2))
    return params


def prepare_layer_params(p, n_head):
    """PyTorch layout -> kernel layout.

    Pre-transposed bf16 weights, 2D f32 biases, and the attention scale
    1/sqrt(d_head) folded into the q-columns of wqkv/bqkv (in f32, before the
    bf16 cast).
    """
    (ln1_w, ln1_b, wqkv, bqkv, wo, bo, ln2_w, ln2_b, w1, b1, w2, b2) = p
    E = wo.shape[0]
    d_head = E // n_head
    scale = 1.0 / (d_head ** 0.5)
    wqkv = jnp.asarray(wqkv, jnp.float32).at[:E, :].multiply(scale)
    bqkv = jnp.asarray(bqkv, jnp.float32).at[:E].multiply(scale)
    row = lambda v: jnp.asarray(v, jnp.float32).reshape(1, -1)
    return (
        row(ln1_w), row(ln1_b),
        jnp.asarray(wqkv.T, jnp.bfloat16),   # (E, 3E)
        row(bqkv),
        jnp.asarray(wo.T, jnp.bfloat16),     # (E, E)
        row(bo),
        row(ln2_w), row(ln2_b),
        jnp.asarray(w1.T, jnp.bfloat16),     # (E, mlp_width)
        row(b1),
        jnp.asarray(w2.T, jnp.bfloat16),     # (mlp_width, E)
        row(b2),
    )


# ----------------------------------------------------------------------------
# Pure-JAX reference (f32, PyTorch layout) for validation
# ----------------------------------------------------------------------------

def reference_forward(x_lne, torch_params, n_head):
    x = x_lne.astype(jnp.float32)
    L, N, E = x.shape
    d = E // n_head

    def ln(z, w, b):
        mu = jnp.mean(z, axis=-1, keepdims=True)
        var = jnp.mean(jnp.square(z - mu), axis=-1, keepdims=True)
        return (z - mu) / jnp.sqrt(var + 1e-5) * w + b

    for (ln1_w, ln1_b, wqkv, bqkv, wo, bo, ln2_w, ln2_b, w1, b1, w2, b2) in torch_params:
        xn = ln(x, ln1_w, ln1_b)
        qkv = xn @ wqkv.T + bqkv
        q, k, v = qkv[..., :E], qkv[..., E:2 * E], qkv[..., 2 * E:]
        heads = lambda t: jnp.transpose(t.reshape(L, N, n_head, d), (1, 2, 0, 3))
        qh, kh, vh = heads(q), heads(k), heads(v)
        s = jnp.einsum('nhqd,nhkd->nhqk', qh, kh) * (1.0 / d ** 0.5)
        p = jax.nn.softmax(s, axis=-1)
        ctx = jnp.einsum('nhqk,nhkd->nhqd', p, vh)
        ctx = jnp.transpose(ctx, (2, 0, 1, 3)).reshape(L, N, E)
        x = x + ctx @ wo.T + bo
        xn2 = ln(x, ln2_w, ln2_b)
        h = jax.nn.gelu(xn2 @ w1.T + b1, approximate=False)
        x = x + h @ w2.T + b2
    return x


# ----------------------------------------------------------------------------
# Main
# ----------------------------------------------------------------------------

if __name__ == "__main__":
    # Small shapes consistent with the module: seq L=8, batch N=2, width E=32,
    # heads=4, layers=2, mlp_ratio=4 -> mlp_width=128.
    L, N, WIDTH, HEADS, LAYERS = 8, 2, 32, 4, 2

    key = jax.random.PRNGKey(0)
    k_x, k_p = jax.random.split(key)
    x = jax.random.normal(k_x, (L, N, WIDTH), jnp.float32)

    torch_params = init_transformer_params(k_p, WIDTH, LAYERS)
    kernel_params = [prepare_layer_params(p, HEADS) for p in torch_params]

    out = transformer_forward(x, kernel_params, HEADS)
    out = jax.block_until_ready(out)
    assert out.shape == (L, N, WIDTH)
    assert bool(jnp.all(jnp.isfinite(out)))

    ref = reference_forward(x, torch_params, HEADS)
    max_err = float(jnp.max(jnp.abs(out - ref)))
    assert bool(jnp.allclose(out, ref, atol=5e-2, rtol=5e-2)), max_err

    print("KERNEL_OK")
</pallas_src>

<mosaic_0001>
module attributes {stable_mosaic.version = 11 : i64} {
  func.func @_probe_kernel(%arg0: i32, %arg1: memref<8x128xf32, #tpu.memory_space<vmem>>, %arg2: memref<8x128xf32, #tpu.memory_space<vmem>>, %arg3: memref<8x128xf32, #tpu.memory_space<vmem>>) attributes {dimension_semantics = [#tpu.dimension_semantics<arbitrary>], iteration_bounds = array<i64: 2>, scalar_prefetch = 0 : i64, scratch_operands = 0 : i64, tpu.core_type = #tpu.core_type<tc>, window_params = [{transform_indices = @transform_0, window_bounds = array<i64: 8, 128>}, {pipeline_mode = #tpu.pipeline_mode<synchronous>, transform_indices = @transform_1, window_bounds = array<i64: 8, 128>}, {transform_indices = @transform_2, window_bounds = array<i64: 8, 128>}]} {
    %c0 = arith.constant 0 : index
    %c0_0 = arith.constant 0 : index
    %0 = vector.load %arg1[%c0, %c0_0] : memref<8x128xf32, #tpu.memory_space<vmem>>, vector<8x128xf32>
    %c0_1 = arith.constant 0 : index
    %c0_2 = arith.constant 0 : index
    %1 = vector.load %arg2[%c0_1, %c0_2] : memref<8x128xf32, #tpu.memory_space<vmem>>, vector<8x128xf32>
    %2 = arith.addf %0, %1 : vector<8x128xf32>
    %c0_3 = arith.constant 0 : index
    %c0_4 = arith.constant 0 : index
    %3 = vector.load %arg3[%c0_3, %c0_4] : memref<8x128xf32, #tpu.memory_space<vmem>>, vector<8x128xf32>
    tpu.vector_store %arg3[%c0_3, %c0_4], %2 {strides = array<i32>} : memref<8x128xf32, #tpu.memory_space<vmem>>, vector<8x128xf32>,
    return
  }
  func.func @transform_0(%arg0: i32) -> (i32, i32) {
    %c0_i32 = arith.constant 0 : i32
    %c0_i32_0 = arith.constant 0 : i32
    return %arg0, %c0_i32 : i32, i32
  }
  func.func @transform_1(%arg0: i32) -> (i32, i32) {
    %c0_i32 = arith.constant 0 : i32
    %c0_i32_0 = arith.constant 0 : i32
    %c0_i32_1 = arith.constant 0 : i32
    return %c0_i32, %c0_i32_0 : i32, i32
  }
  func.func @transform_2(%arg0: i32) -> (i32, i32) {
    %c0_i32 = arith.constant 0 : i32
    %c0_i32_0 = arith.constant 0 : i32
    return %arg0, %c0_i32 : i32, i32
  }
}

module attributes {stable_mosaic.version = 11 : i64} {
  func.func @attn_block_kernel(%arg0: i32, %arg1: memref<2x8x32xbf16, #tpu.memory_space<vmem>>, %arg2: memref<1x32xf32, #tpu.memory_space<vmem>>, %arg3: memref<1x32xf32, #tpu.memory_space<vmem>>, %arg4: memref<32x96xbf16, #tpu.memory_space<vmem>>, %arg5: memref<1x96xf32, #tpu.memory_space<vmem>>, %arg6: memref<32x32xbf16, #tpu.memory_space<vmem>>, %arg7: memref<1x32xf32, #tpu.memory_space<vmem>>, %arg8: memref<2x8x32xbf16, #tpu.memory_space<vmem>>) attributes {dimension_semantics = [#tpu.dimension_semantics<parallel>], iteration_bounds = array<i64: 1>, scalar_prefetch = 0 : i64, scratch_operands = 0 : i64, tpu.core_type = #tpu.core_type<tc>, window_params = [{transform_indices = @transform_0, window_bounds = array<i64: 2, 8, 32>}, {pipeline_mode = #tpu.pipeline_mode<synchronous>, transform_indices = @transform_1, window_bounds = array<i64: 1, 32>}, {pipeline_mode = #tpu.pipeline_mode<synchronous>, transform_indices = @transform_2, window_bounds = array<i64: 1, 32>}, {pipeline_mode = #tpu.pipeline_mode<synchronous>, transform_indices = @transform_3, window_bounds = array<i64: 32, 96>}, {pipeline_mode = #tpu.pipeline_mode<synchronous>, transform_indices = @transform_4, window_bounds = array<i64: 1, 96>}, {pipeline_mode = #tpu.pipeline_mode<synchronous>, transform_indices = @transform_5, window_bounds = array<i64: 32, 32>}, {pipeline_mode = #tpu.pipeline_mode<synchronous>, transform_indices = @transform_6, window_bounds = array<i64: 1, 32>}, {transform_indices = @transform_7, window_bounds = array<i64: 2, 8, 32>}]} {
    %c0 = arith.constant 0 : index
    %c0_0 = arith.constant 0 : index
    %c0_1 = arith.constant 0 : index
    %0 = vector.load %arg1[%c0, %c0_0, %c0_1] : memref<2x8x32xbf16, #tpu.memory_space<vmem>>, vector<2x8x32xbf16>
    %1 = arith.extf %0 : vector<2x8x32xbf16> to vector<2x8x32xf32>
    %2 = vector.shape_cast %1 : vector<2x8x32xf32> to vector<16x32xf32>
    %c0_2 = arith.constant 0 : index
    %c0_3 = arith.constant 0 : index
    %3 = vector.load %arg2[%c0_2, %c0_3] : memref<1x32xf32, #tpu.memory_space<vmem>>, vector<1x32xf32>
    %4 = vector.shape_cast %3 : vector<1x32xf32> to vector<32xf32>
    %c0_4 = arith.constant 0 : index
    %c0_5 = arith.constant 0 : index
    %5 = vector.load %arg3[%c0_4, %c0_5] : memref<1x32xf32, #tpu.memory_space<vmem>>, vector<1x32xf32>
    %6 = vector.shape_cast %5 : vector<1x32xf32> to vector<32xf32>
    %cst = arith.constant dense<0.000000e+00> : vector<16xf32>
    %7 = vector.multi_reduction <add>, %2, %cst [1] : vector<16x32xf32> to vector<16xf32>
    %8 = vector.shape_cast %7 : vector<16xf32> to vector<16x1xf32>
    %cst_6 = arith.constant 3.200000e+01 : f32
    %9 = vector.broadcast %cst_6 : f32 to vector<16x1xf32>
    %10 = arith.divf %8, %9 : vector<16x1xf32>
    %11 = vector.broadcast %10 : vector<16x1xf32> to vector<16x32xf32>
    %12 = arith.subf %2, %11 : vector<16x32xf32>
    %13 = arith.mulf %12, %12 : vector<16x32xf32>
    %cst_7 = arith.constant dense<0.000000e+00> : vector<16xf32>
    %14 = vector.multi_reduction <add>, %13, %cst_7 [1] : vector<16x32xf32> to vector<16xf32>
    %15 = vector.shape_cast %14 : vector<16xf32> to vector<16x1xf32>
    %cst_8 = arith.constant 3.200000e+01 : f32
    %16 = vector.broadcast %cst_8 : f32 to vector<16x1xf32>
    %17 = arith.divf %15, %16 : vector<16x1xf32>
    %18 = vector.broadcast %10 : vector<16x1xf32> to vector<16x32xf32>
    %19 = arith.subf %2, %18 : vector<16x32xf32>
    %cst_9 = arith.constant 9.99999974E-6 : f32
    %20 = vector.broadcast %cst_9 : f32 to vector<16x1xf32>
    %21 = arith.addf %17, %20 : vector<16x1xf32>
    %22 = math.rsqrt %21 : vector<16x1xf32>
    %23 = vector.broadcast %22 : vector<16x1xf32> to vector<16x32xf32>
    %24 = arith.mulf %19, %23 : vector<16x32xf32>
    %25 = vector.shape_cast %4 : vector<32xf32> to vector<1x32xf32>
    %26 = vector.broadcast %25 : vector<1x32xf32> to vector<16x32xf32>
    %27 = arith.mulf %24, %26 : vector<16x32xf32>
    %28 = vector.shape_cast %6 : vector<32xf32> to vector<1x32xf32>
    %29 = vector.broadcast %28 : vector<1x32xf32> to vector<16x32xf32>
    %30 = arith.addf %27, %29 : vector<16x32xf32>
    %31 = arith.truncf %30 : vector<16x32xf32> to vector<16x32xbf16>
    %c0_10 = arith.constant 0 : index
    %c0_11 = arith.constant 0 : index
    %32 = vector.load %arg4[%c0_10, %c0_11] : memref<32x96xbf16, #tpu.memory_space<vmem>>, vector<32x96xbf16>
    %cst_12 = arith.constant dense<0.000000e+00> : vector<16x96xf32>
    %33 = tpu.matmul %31, %32, %cst_12 {dimension_numbers = #tpu.dot_dimension_numbers<[1], [0], [0], [1], [0, 0, 1, 1], [], []>} : vector<16x32xbf16>, vector<32x96xbf16>, vector<16x96xf32> -> vector<16x96xf32>
    %c0_13 = arith.constant 0 : index
    %c0_14 = arith.constant 0 : index
    %34 = vector.load %arg5[%c0_13, %c0_14] : memref<1x96xf32, #tpu.memory_space<vmem>>, vector<1x96xf32>
    %35 = vector.shape_cast %34 : vector<1x96xf32> to vector<96xf32>
    %36 = vector.shape_cast %35 : vector<96xf32> to vector<1x96xf32>
    %37 = vector.broadcast %36 : vector<1x96xf32> to vector<16x96xf32>
    %38 = arith.addf %33, %37 : vector<16x96xf32>
    %39 = vector.extract_strided_slice %38 {offsets = [0, 0], sizes = [8, 96], strides = [1, 1]} : vector<16x96xf32> to vector<8x96xf32>
    %40 = vector.extract_strided_slice %39 {offsets = [0, 0], sizes = [8, 32], strides = [1, 1]} : vector<8x96xf32> to vector<8x32xf32>
    %41 = vector.shape_cast %40 : vector<8x32xf32> to vector<8x4x8xf32>
    %42 = tpu.transpose %41, [1, 0, 2] : vector<8x4x8xf32> -> vector<4x8x8xf32>
    %43 = arith.truncf %42 : vector<4x8x8xf32> to vector<4x8x8xbf16>
    %44 = vector.extract_strided_slice %39 {offsets = [0, 32], sizes = [8, 32], strides = [1, 1]} : vector<8x96xf32> to vector<8x32xf32>
    %45 = vector.shape_cast %44 : vector<8x32xf32> to vector<8x4x8xf32>
    %46 = tpu.transpose %45, [1, 0, 2] : vector<8x4x8xf32> -> vector<4x8x8xf32>
    %47 = arith.truncf %46 : vector<4x8x8xf32> to vector<4x8x8xbf16>
    %48 = vector.extract_strided_slice %39 {offsets = [0, 64], sizes = [8, 32], strides = [1, 1]} : vector<8x96xf32> to vector<8x32xf32>
    %49 = vector.shape_cast %48 : vector<8x32xf32> to vector<8x4x8xf32>
    %50 = tpu.transpose %49, [1, 0, 2] : vector<8x4x8xf32> -> vector<4x8x8xf32>
    %51 = arith.truncf %50 : vector<4x8x8xf32> to vector<4x8x8xbf16>
    "tpu.trace_start"() <{level = 10 : i32, message = "hqd,hkd->hqk"}> : () -> ()
    %cst_15 = arith.constant dense<0.000000e+00> : vector<4x8x8xf32>
    %52 = tpu.matmul %43, %47, %cst_15 {dimension_numbers = #tpu.dot_dimension_numbers<[2], [2], [1], [1], [0, 0, 0, 1, 1, 1], [0], [0]>} : vector<4x8x8xbf16>, vector<4x8x8xbf16>, vector<4x8x8xf32> -> vector<4x8x8xf32>
    "tpu.trace_stop"() : () -> ()
    %cst_16 = arith.constant dense<0xFF800000> : vector<4x8xf32>
    %53 = vector.multi_reduction <maximumf>, %52, %cst_16 [2] : vector<4x8x8xf32> to vector<4x8xf32>
    %54 = vector.shape_cast %53 : vector<4x8xf32> to vector<4x8x1xf32>
    %55 = vector.broadcast %54 : vector<4x8x1xf32> to vector<4x8x8xf32>
    %56 = arith.subf %52, %55 : vector<4x8x8xf32>
    %57 = math.exp %56 : vector<4x8x8xf32>
    %cst_17 = arith.constant dense<0.000000e+00> : vector<4x8xf32>
    %58 = vector.multi_reduction <add>, %57, %cst_17 [2] : vector<4x8x8xf32> to vector<4x8xf32>
    %59 = vector.shape_cast %58 : vector<4x8xf32> to vector<4x8x1xf32>
    %60 = arith.truncf %57 : vector<4x8x8xf32> to vector<4x8x8xbf16>
    "tpu.trace_start"() <{level = 10 : i32, message = "hqk,hkd->hqd"}> : () -> ()
    %cst_18 = arith.constant dense<0.000000e+00> : vector<4x8x8xf32>
    %61 = tpu.matmul %60, %51, %cst_18 {dimension_numbers = #tpu.dot_dimension_numbers<[2], [1], [1], [2], [0, 0, 0, 1, 1, 2], [0], [0]>} : vector<4x8x8xbf16>, vector<4x8x8xbf16>, vector<4x8x8xf32> -> vector<4x8x8xf32>
    "tpu.trace_stop"() : () -> ()
    %62 = tpu.reciprocal %59 {approx = true} : vector<4x8x1xf32> -> vector<4x8x1xf32>
    %63 = vector.broadcast %62 : vector<4x8x1xf32> to vector<4x8x8xf32>
    %64 = arith.mulf %61, %63 : vector<4x8x8xf32>
    %65 = tpu.transpose %64, [1, 0, 2] : vector<4x8x8xf32> -> vector<8x4x8xf32>
    %66 = vector.shape_cast %65 : vector<8x4x8xf32> to vector<8x32xf32>
    %67 = vector.extract_strided_slice %38 {offsets = [8, 0], sizes = [8, 96], strides = [1, 1]} : vector<16x96xf32> to vector<8x96xf32>
    %68 = vector.extract_strided_slice %67 {offsets = [0, 0], sizes = [8, 32], strides = [1, 1]} : vector<8x96xf32> to vector<8x32xf32>
    %69 = vector.shape_cast %68 : vector<8x32xf32> to vector<8x4x8xf32>
    %70 = tpu.transpose %69, [1, 0, 2] : vector<8x4x8xf32> -> vector<4x8x8xf32>
    %71 = arith.truncf %70 : vector<4x8x8xf32> to vector<4x8x8xbf16>
    %72 = vector.extract_strided_slice %67 {offsets = [0, 32], sizes = [8, 32], strides = [1, 1]} : vector<8x96xf32> to vector<8x32xf32>
    %73 = vector.shape_cast %72 : vector<8x32xf32> to vector<8x4x8xf32>
    %74 = tpu.transpose %73, [1, 0, 2] : vector<8x4x8xf32> -> vector<4x8x8xf32>
    %75 = arith.truncf %74 : vector<4x8x8xf32> to vector<4x8x8xbf16>
    %76 = vector.extract_strided_slice %67 {offsets = [0, 64], sizes = [8, 32], strides = [1, 1]} : vector<8x96xf32> to vector<8x32xf32>
    %77 = vector.shape_cast %76 : vector<8x32xf32> to vector<8x4x8xf32>
    %78 = tpu.transpose %77, [1, 0, 2] : vector<8x4x8xf32> -> vector<4x8x8xf32>
    %79 = arith.truncf %78 : vector<4x8x8xf32> to vector<4x8x8xbf16>
    "tpu.trace_start"() <{level = 10 : i32, message = "hqd,hkd->hqk"}> : () -> ()
    %cst_19 = arith.constant dense<0.000000e+00> : vector<4x8x8xf32>
    %80 = tpu.matmul %71, %75, %cst_19 {dimension_numbers = #tpu.dot_dimension_numbers<[2], [2], [1], [1], [0, 0, 0, 1, 1, 1], [0], [0]>} : vector<4x8x8xbf16>, vector<4x8x8xbf16>, vector<4x8x8xf32> -> vector<4x8x8xf32>
    "tpu.trace_stop"() : () -> ()
    %cst_20 = arith.constant dense<0xFF800000> : vector<4x8xf32>
    %81 = vector.multi_reduction <maximumf>, %80, %cst_20 [2] : vector<4x8x8xf32> to vector<4x8xf32>
    %82 = vector.shape_cast %81 : vector<4x8xf32> to vector<4x8x1xf32>
    %83 = vector.broadcast %82 : vector<4x8x1xf32> to vector<4x8x8xf32>
    %84 = arith.subf %80, %83 : vector<4x8x8xf32>
    %85 = math.exp %84 : vector<4x8x8xf32>
    %cst_21 = arith.constant dense<0.000000e+00> : vector<4x8xf32>
    %86 = vector.multi_reduction <add>, %85, %cst_21 [2] : vector<4x8x8xf32> to vector<4x8xf32>
    %87 = vector.shape_cast %86 : vector<4x8xf32> to vector<4x8x1xf32>
    %88 = arith.truncf %85 : vector<4x8x8xf32> to vector<4x8x8xbf16>
    "tpu.trace_start"() <{level = 10 : i32, message = "hqk,hkd->hqd"}> : () -> ()
    %cst_22 = arith.constant dense<0.000000e+00> : vector<4x8x8xf32>
    %89 = tpu.matmul %88, %79, %cst_22 {dimension_numbers = #tpu.dot_dimension_numbers<[2], [1], [1], [2], [0, 0, 0, 1, 1, 2], [0], [0]>} : vector<4x8x8xbf16>, vector<4x8x8xbf16>, vector<4x8x8xf32> -> vector<4x8x8xf32>
    "tpu.trace_stop"() : () -> ()
    %90 = tpu.reciprocal %87 {approx = true} : vector<4x8x1xf32> -> vector<4x8x1xf32>
    %91 = vector.broadcast %90 : vector<4x8x1xf32> to vector<4x8x8xf32>
    %92 = arith.mulf %89, %91 : vector<4x8x8xf32>
    %93 = tpu.transpose %92, [1, 0, 2] : vector<4x8x8xf32> -> vector<8x4x8xf32>
    %94 = vector.shape_cast %93 : vector<8x4x8xf32> to vector<8x32xf32>
    %95 = tpu.concatenate %66, %94 in 0 : vector<8x32xf32>, vector<8x32xf32> -> vector<16x32xf32>
    %96 = arith.truncf %95 : vector<16x32xf32> to vector<16x32xbf16>
    %c0_23 = arith.constant 0 : index
    %c0_24 = arith.constant 0 : index
    %97 = vector.load %arg6[%c0_23, %c0_24] : memref<32x32xbf16, #tpu.memory_space<vmem>>, vector<32x32xbf16>
    %cst_25 = arith.constant dense<0.000000e+00> : vector<16x32xf32>
    %98 = tpu.matmul %96, %97, %cst_25 {dimension_numbers = #tpu.dot_dimension_numbers<[1], [0], [0], [1], [0, 0, 1, 1], [], []>} : vector<16x32xbf16>, vector<32x32xbf16>, vector<16x32xf32> -> vector<16x32xf32>
    %c0_26 = arith.constant 0 : index
    %c0_27 = arith.constant 0 : index
    %99 = vector.load %arg7[%c0_26, %c0_27] : memref<1x32xf32, #tpu.memory_space<vmem>>, vector<1x32xf32>
    %100 = vector.shape_cast %99 : vector<1x32xf32> to vector<32xf32>
    %101 = vector.shape_cast %100 : vector<32xf32> to vector<1x32xf32>
    %102 = vector.broadcast %101 : vector<1x32xf32> to vector<16x32xf32>
    %103 = arith.addf %98, %102 : vector<16x32xf32>
    %104 = arith.addf %2, %103 : vector<16x32xf32>
    %105 = vector.shape_cast %104 : vector<16x32xf32> to vector<2x8x32xf32>
    %106 = arith.truncf %105 : vector<2x8x32xf32> to vector<2x8x32xbf16>
    %c0_28 = arith.constant 0 : index
    %c0_29 = arith.constant 0 : index
    %c0_30 = arith.constant 0 : index
    %107 = vector.load %arg8[%c0_28, %c0_29, %c0_30] : memref<2x8x32xbf16, #tpu.memory_space<vmem>>, vector<2x8x32xbf16>
    tpu.vector_store %arg8[%c0_28, %c0_29, %c0_30], %106 {strides = array<i32>} : memref<2x8x32xbf16, #tpu.memory_space<vmem>>, vector<2x8x32xbf16>,
    return
  }
  func.func @transform_0(%arg0: i32) -> (i32, i32, i32) {
    %c0_i32 = arith.constant 0 : i32
    %c0_i32_0 = arith.constant 0 : i32
    %c0_i32_1 = arith.constant 0 : i32
    return %arg0, %c0_i32, %c0_i32_0 : i32, i32, i32
  }
  func.func @transform_1(%arg0: i32) -> (i32, i32) {
    %c0_i32 = arith.constant 0 : i32
    %c0_i32_0 = arith.constant 0 : i32
    %c0_i32_1 = arith.constant 0 : i32
    return %c0_i32, %c0_i32_0 : i32, i32
  }
  func.func @transform_2(%arg0: i32) -> (i32, i32) {
    %c0_i32 = arith.constant 0 : i32
    %c0_i32_0 = arith.constant 0 : i32
    %c0_i32_1 = arith.constant 0 : i32
    return %c0_i32, %c0_i32_0 : i32, i32
  }
  func.func @transform_3(%arg0: i32) -> (i32, i32) {
    %c0_i32 = arith.constant 0 : i32
    %c0_i32_0 = arith.constant 0 : i32
    %c0_i32_1 = arith.constant 0 : i32
    return %c0_i32, %c0_i32_0 : i32, i32
  }
  func.func @transform_4(%arg0: i32) -> (i32, i32) {
    %c0_i32 = arith.constant 0 : i32
    %c0_i32_0 = arith.constant 0 : i32
    %c0_i32_1 = arith.constant 0 : i32
    return %c0_i32, %c0_i32_0 : i32, i32
  }
  func.func @transform_5(%arg0: i32) -> (i32, i32) {
    %c0_i32 = arith.constant 0 : i32
    %c0_i32_0 = arith.constant 0 : i32
    %c0_i32_1 = arith.constant 0 : i32
    return %c0_i32, %c0_i32_0 : i32, i32
  }
  func.func @transform_6(%arg0: i32) -> (i32, i32) {
    %c0_i32 = arith.constant 0 : i32
    %c0_i32_0 = arith.constant 0 : i32
    %c0_i32_1 = arith.constant 0 : i32
    return %c0_i32, %c0_i32_0 : i32, i32
  }
  func.func @transform_7(%arg0: i32) -> (i32, i32, i32) {
    %c0_i32 = arith.constant 0 : i32
    %c0_i32_0 = arith.constant 0 : i32
    %c0_i32_1 = arith.constant 0 : i32
    return %arg0, %c0_i32, %c0_i32_0 : i32, i32, i32
  }
}

</mosaic_0001>

<bundles_post_ra>
// kernel: tpu_custom_call.1
= control target key start
LH: loop header
LB: loop body
LE: loop exit
PB: predicated region body
PF: predicated region fallthrough
CT: control target
= control target key end

     0   :  { %7 = vsyncpa [#allocation3], 0  ;;  %s649_s0 = inlined_call_operand.hbm [shape: f32[16,128], index: 0, kind: input, shape index: {}]   ;;  %s650_s1 = inlined_call_operand.hbm [shape: f32[8,128], index: 1, kind: input, shape index: {}]   ;;  %s651_s2 = inlined_call_operand.hbm [shape: f32[16,128], index: 2, kind: output, shape index: {}]  }
   0x1   :  { %9 = vsyncpa [#allocation3 + $0x1], 0 }
   0x2   :  { %10 = vsyncpa [#allocation6], 0 }
   0x3   :  { %11 = vsyncpa [#allocation4], 0 }
   0x4   :  { %13 = vsyncpa [#allocation4 + $0x1], 0  ;;  %s483_s9 = smov 0   ;;  %s485_s10 = smov 0  }
   0x5   :  { %s487_s11 = smov 0   ;;  %s489_s12 = smov 0  }
   0x6 LB: > { %s504_s13 = sadd.s32 4294967295, %s463_s12   ;;  %s270_s14 = sadd.s32 4294967294, %s463_s12   ;;  %s463_s12 = sphi %s489_s12, %s674_s12   ;;  %s459_s11 = sphi %s487_s11, %s673_s11   ;;  %s455_s10 = sphi %s485_s10, %s672_s10   ;;  %s451_s9 = sphi %s483_s9, %s671_s9  }
   0x7   : > { %p39_p0 = scmp.ne.s32.totalorder %s455_s10, %s451_s9  ;;  %p652_p1 = scmp.eq.s32.totalorder %s504_s13, 0 }
   0x8   : > { %p90_p3 = scmp.eq.s32.totalorder %s270_s14, 1  ;;  %p271_p5 = scmp.ge.s32.totalorder %s463_s12, 1 }
   0x9   : > { %p513_p4 = por %p652_p1, %p39_p0  ;;  %p97_p7 = scmp.lt.s32.totalorder %s463_s12, 3 }
   0xa   : > { %p518_p6 = por %p90_p3, %p39_p0  ;;  %s465_s18 = smov [#allocation5]  }
   0xb   : > { %s656_s15 = scalar_select %p513_p4, 1, 0 }
   0xc   : > { %s657_s16 = scalar_select %p518_p6, 1, 0 }
   0xd   : > { %p523_p8 = pnand %p271_p5, %p97_p7  ;;  %s110_s19 = sshll.u32 %s465_s18, 4  ;;  %s111_s19 = int_to_ptr.vmem [resolvable:$true] %s110_s19 }
   0xe   : > { %s531_s20 = sadd.s32 1, %s463_s12   ;;  %s26_s24 = sadd.s32 1, %s459_s11 }
   0xf   : > { %s658_s17 = scalar_select %p523_p8, 1, 0 }
  0x10   : > { %p292_p10 = pneg %p523_p8  ;;  %s23_s22 = ssub.s32 %s463_s12, %s531_s20 }
  0x11   : > { %p541_p12 = scmp.eq.s32.totalorder %s23_s22, 0  ;;  %p33_p13 = scmp.ne.s32.totalorder %s459_s11, %s455_s10 }
  0x12   : > { %p535_p11 = pnand %p292_p10, %p652_p1  ;;  %s352_s25 = scalar_lea.vmem %s111_s19, 128 }
  0x13   : > { %p353_p3 = scmp.ne.s32.totalorder %s111_s19, %s352_s25  ;;  %p360_p9 = scmp.lt.s32.totalorder %s111_s19, %s111_s19 }
  0x14   : > { %p343_p0 = pneg %p535_p11  ;;  %p361_p2 = scmp.lt.s32.totalorder %s352_s25, %s352_s25 }
  0x16   : > { %p355_p5 = pnand %p353_p3, %p343_p0  ;;  %p362_p10 = por %p361_p2, %p360_p9 }
  0x18   : > { %p356_p7 = pneg %p355_p5 }
  0x1a   : > { %p363_p1 = pnand %p362_p10, %p356_p7 }
  0x1c   : > { %366 = shalt.err (!%p363_p1)
}
  0x1d   : > { %295 = dma.hbm_to_vmem [thread:$0]  (!%p535_p11), %s650_s1, 128, %s111_s19, [#allocation6]  }
  0x1e   : > { %s558_s28 = scalar_select %p541_p12, %s459_s11, %s26_s24  }
  0x1f   : > { %p34_p1 = scmp.eq.s32.totalorder %s463_s12, 0  ;;  %p661_p2 = scmp.eq.s32.totalorder %s504_s13, 1 }
  0x20   : > { %p305_p0 = scmp.lt.s32.totalorder %s463_s12, 2  ;;  %s121_s30 = sand.u32 1, %s459_s11  }
  0x21   : > { %p566_p9 = por %p661_p2, %p33_p13  ;;  %p35_p3 = por %p34_p1, %p33_p13 }
  0x22   : > { %s274_s3 = sshll.u32 %s121_s30, 3  ;;  %s275_s4 = sshll.u32 %s463_s12, 7 }
  0x23   : > { %s662_s29 = scalar_select %p566_p9, 1, 0 }
  0x24   : > { %s579_s7 = scalar_lea.hbm %s649_s0, %s275_s4  ;;  %s125_s8 = scalar_lea.vmem [#allocation2], %s274_s3 }
  0x25   : > { %s132_s14 = sshll.u32 %s125_s8, 4  ;;  %p581_p11 = pnand %p305_p0, %p35_p3  ;;  %s133_s14 = int_to_ptr.vmem [resolvable:$true] %s132_s14 }
  0x26   : > { %s122_s19 = scalar_lea.sflag [#allocation3], %s121_s30  ;;  %s367_s21 = scalar_lea.hbm %s579_s7, 128 }
  0x27   : > { %p368_p12 = scmp.ne.s32.totalorder %s579_s7, %s367_s21  ;;  %p369_p13 = pneg %p581_p11 }
  0x28   : > { %s372_s24 = scalar_lea.hbm %s649_s0, 256  ;;  %p373_p10 = scmp.lt.s32.totalorder %s579_s7, %s649_s0 }
  0x29   : > { %p370_p5 = pnand %p369_p13, %p368_p12  ;;  %p374_p1 = scmp.lt.s32.totalorder %s372_s24, %s367_s21 }
  0x2b   : > { %p371_p7 = pneg %p370_p5  ;;  %p375_p2 = por %p374_p1, %p373_p10 }
  0x2d   : > { %p376_p0 = pnand %p375_p2, %p371_p7 }
  0x2f   : > { %379 = shalt.err (!%p376_p0)
}
  0x30   : > { %s380_s27 = scalar_lea.vmem %s133_s14, 128  ;;  %s466_s30 = smov [#allocation2]  }
  0x31   : > { %p381_p3 = scmp.ne.s32.totalorder %s133_s14, %s380_s27  ;;  %s385_s3 = sshll.u32 %s466_s30, 4  ;;  %s386_s3 = int_to_ptr.vmem [resolvable:$false] %s385_s3 }
  0x32   : > { %s387_s4 = scalar_lea.vmem %s386_s3, 256  ;;  %p388_p12 = scmp.lt.s32.totalorder %s133_s14, %s386_s3 }
  0x33   : > { %p383_p6 = pnand %p381_p3, %p369_p13  ;;  %p389_p5 = scmp.lt.s32.totalorder %s387_s4, %s380_s27 }
  0x35   : > { %p384_p9 = pneg %p383_p6  ;;  %p390_p4 = por %p389_p5, %p388_p12 }
  0x37   : > { %p391_p8 = pnand %p390_p4, %p384_p9 }
  0x39   : > { %394 = shalt.err (!%p391_p8)
}
  0x3a   : > { %299 = dma.hbm_to_vmem [thread:$0]  (!%p581_p11), %s579_s7, 128, %s133_s14, %s122_s19  }
  0x3b   : > { %p664_p7 = scmp.ne.s32.totalorder %s658_s17, 0 }
  0x3c   : > { %s602_s5 = sand.u32 (!%p664_p7), 1, %s455_s10   ;;  %p665_p6 = scmp.ne.s32.totalorder (!%p664_p7), %s656_s15, 0 }
  0x3d   : > { %141 = sbr.rel (%p664_p7) target bundleno = 95 (0x5f), region = 28  ;;  %s277_s6 = sshll.u32 (!%p664_p7), %s602_s5, 3 }
  0x3e   : > { %s144_s8 = scalar_lea.sflag (!%p664_p7), [#allocation3], %s602_s5  ;;  %s147_s21 = scalar_lea.vmem (!%p664_p7), [#allocation2], %s277_s6 }
  0x42   : > { %438 = dma.done.wait (%p665_p6), %s144_s8, 128  }
  0x43   : > { %440 = vsyncadd (%p665_p6), %s144_s8, 4294967168  ;;  %p666_p4 = scmp.eq.s32.totalorder %s504_s13, 0 }
  0x45   : > { %442 = dma.done.wait (%p666_p4), [#allocation6], 128   ;;  %p667_p8 = pmov %p666_p4 }
  0x46   : > { %s171_s17 = scalar_lea.vmem [#allocation7], %s277_s6  ;;  %s281_s14 = sshll.u32 %s504_s13, 7  ;;  %v172_v0 = vld [vmem:[%s147_s21] sm:$0xff]  ;;  %v173_v1 = vld [vmem:[#allocation5] sm:$0xff] }
  0x47   : > { %444 = vsyncadd (%p667_p8), [#allocation6], 4294967168  ;;  %s190_s7 = sshll.u32 %s171_s17, 4  ;;  %v174_v2 = vadd.f32 %v173_v1, %v172_v0  ;;  %s188_s15 = scalar_lea.hbm %s651_s2, %s281_s14  ;;  %s191_s7 = int_to_ptr.vmem [resolvable:$true] %s190_s7 }
  0x48   : > { %s177_s22 = scalar_lea.sflag [#allocation4], %s602_s5  ;;  %s395_s23 = scalar_lea.vmem %s191_s7, 128 }
  0x49   : > { %175 = vst [vmem:[%s171_s17] sm:$0xff] %v174_v2  ;;  %p396_p9 = scmp.ne.s32.totalorder %s191_s7, %s395_s23  ;;  %p668_p11 = scmp.ne.s32.totalorder %s662_s29, 0 }
  0x4a   : > { %s467_s24 = smov [#allocation7]  }
  0x4b   : > { %p397_p13 = pnand %p396_p9, %p668_p11  ;;  %s399_s25 = sshll.u32 %s467_s24, 4  ;;  %s400_s25 = int_to_ptr.vmem [resolvable:$false] %s399_s25 }
  0x4c   : > { %s401_s26 = scalar_lea.vmem %s400_s25, 256  ;;  %p402_p1 = scmp.lt.s32.totalorder %s191_s7, %s400_s25 }
  0x4d   : > { %p398_p10 = pneg %p397_p13  ;;  %p403_p2 = scmp.lt.s32.totalorder %s401_s26, %s395_s23 }
  0x4f   : > { %p404_p0 = por %p403_p2, %p402_p1 }
  0x51   : > { %p405_p3 = pnand %p404_p0, %p398_p10 }
  0x53   : > { %408 = shalt.err (!%p405_p3)
}
  0x54   : > { %s409_s13 = scalar_lea.hbm %s188_s15, 128  ;;  %s413_s3 = scalar_lea.hbm %s651_s2, 256 }
  0x55   : > { %p410_p12 = scmp.ne.s32.totalorder %s188_s15, %s409_s13  ;;  %p414_p6 = scmp.lt.s32.totalorder %s188_s15, %s651_s2 }
  0x56   : > { %p415_p4 = scmp.lt.s32.totalorder %s413_s3, %s409_s13 }
  0x57   : > { %p411_p5 = pnand %p410_p12, %p668_p11 }
  0x58   : > { %p416_p8 = por %p415_p4, %p414_p6 }
  0x59   : > { %p412_p7 = pneg %p411_p5 }
  0x5b   : > { %p417_p9 = pnand %p416_p8, %p412_p7 }
  0x5d   : > { %420 = shalt.err (!%p417_p9)
}
  0x5e   : > { %290 = dma.vmem_to_hbm [thread:$0]  (%p668_p11), %s191_s7, 128, %s188_s15, %s177_s22  }
  0x5f PF: > { %s202_s6 = sand.u32 1, %s451_s9   ;;  %p669_p13 = scmp.ne.s32.totalorder %s657_s16, 0 }
  0x60   : > { %p670_p10 = scmp.ge.s32.totalorder %s463_s12, 2  ;;  %s203_s8 = scalar_lea.sflag [#allocation4], %s202_s6 }
  0x62   : > { %p301_p1 = pnand %p670_p10, %p669_p13 }
  0x64   : > { %p302_p2 = pneg %p301_p1 }
  0x66   : > { %446 = dma.done.wait (%p302_p2), %s203_s8, 128  }
  0x67   : > { %448 = vsyncadd (%p302_p2), %s203_s8, 4294967168  ;;  %p16_p0 = scmp.ge.s32.totalorder %s531_s20, 4   ;;  %s671_s9 = smov %s455_s10 }
  0x68   : > { %s672_s10 = smov %s459_s11  ;;  %s673_s11 = smov %s558_s28 }
  0x69   : > { %s674_s12 = smov %s531_s20  ;;  %18 = sbr.rel (!%p16_p0) target bundleno = 6 (0x6), region = 77 }
  0x6e   :  { %208 = vsyncpa [#allocation3], 1 }
  0x6f   :  { %210 = vsyncpa [#allocation3 + $0x1], 1 }
  0x70   :  { %211 = vsyncpa [#allocation6], 1 }
  0x71   :  { %212 = vsyncpa [#allocation4], 1 }
  0x72   :  { %214 = vsyncpa [#allocation4 + $0x1], 1 }

// kernel: tpu_custom_call.1
= control target key start
LH: loop header
LB: loop body
LE: loop exit
PB: predicated region body
PF: predicated region fallthrough
CT: control target
= control target key end

     0   :  { %12 = vsyncpa [#allocation3], 0  ;;  %s3173_s0 = inlined_call_operand.hbm [shape: bf16[2,8,32], index: 0, kind: input, shape index: {}]   ;;  %s3174_s1 = inlined_call_operand.vmem [shape: f32[1,32], index: 1, kind: input, shape index: {}]   ;;  %s3175_s2 = inlined_call_operand.vmem [shape: f32[1,32], index: 2, kind: input, shape index: {}]   ;;  %s3176_s3 = inlined_call_operand.hbm [shape: bf16[32,96], index: 3, kind: input, shape index: {}]   ;;  %s3177_s4 = inlined_call_operand.vmem [shape: f32[1,96], index: 4, kind: input, shape index: {}]   ;;  %s3178_s5 = inlined_call_operand.hbm [shape: bf16[32,32], index: 5, kind: input, shape index: {}]   ;;  %s3179_s6 = inlined_call_operand.vmem [shape: f32[1,32], index: 6, kind: input, shape index: {}]   ;;  %s3180_s7 = inlined_call_operand.hbm [shape: bf16[2,8,32], index: 7, kind: output, shape index: {}]  }
   0x1   :  { %13 = vsyncpa [#allocation6], 0 }
   0x2   :  { %14 = vsyncpa [#allocation4], 0  ;;  %s2680_s24 = smov [#allocation5]   ;;  %s2681_s26 = smov [#allocation2]  }
   0x3   :  { %s36_s25 = sshll.u32 %s2680_s24, 4  ;;  %s20_s27 = sshll.u32 %s2681_s26, 4  ;;  %s37_s25 = int_to_ptr.vmem [resolvable:$true] %s36_s25  ;;  %s21_s27 = int_to_ptr.vmem [resolvable:$true] %s20_s27 }
   0x4   :  { %s2602_s28 = scalar_lea.vmem %s37_s25, 256  ;;  %p2607_p1 = scmp.lt.s32.totalorder %s37_s25, %s37_s25 }
   0x5   :  { %p2603_p0 = scmp.ne.s32.totalorder %s37_s25, %s2602_s28  ;;  %p2608_p2 = scmp.lt.s32.totalorder %s2602_s28, %s2602_s28 }
   0x7   :  { %p2609_p3 = por %p2608_p2, %p2607_p1 }
   0x9   :  { %p2610_p4 = pnand %p2609_p3, %p2603_p0 }
   0xb   :  { %2613 = shalt.err (!%p2610_p4)
}
   0xc   :  { %s2682_s29 = smov 64   ;;  %s2683_s30 = smov 4  }
   0xd   :  { %42 = dma.hbm_to_vmem [thread:$0]  %s3176_s3, 256, %s37_s25, [#allocation6], %s2682_s29, %s2682_s29, %s2683_s30  }
   0xe   :  { %s2622_s10 = scalar_lea.vmem %s21_s27, 128  ;;  %p2627_p6 = scmp.lt.s32.totalorder %s21_s27, %s21_s27 }
   0xf   :  { %p2623_p5 = scmp.ne.s32.totalorder %s21_s27, %s2622_s10  ;;  %p2628_p7 = scmp.lt.s32.totalorder %s2622_s10, %s2622_s10 }
  0x11   :  { %p2629_p8 = por %p2628_p7, %p2627_p6 }
  0x13   :  { %p2630_p9 = pnand %p2629_p8, %p2623_p5 }
  0x15   :  { %2633 = shalt.err (!%p2630_p9)
}
  0x16   :  { %26 = dma.hbm_to_vmem [thread:$0]  %s3173_s0, 128, %s21_s27, [#allocation3], %s2682_s29, %s2682_s29, %s2683_s30  }
  0x17   :  { %s2684_s13 = smov [#allocation7]  }
  0x18   :  { %s50_s14 = sshll.u32 %s2684_s13, 4  ;;  %s51_s14 = int_to_ptr.vmem [resolvable:$true] %s50_s14 }
  0x19   :  { %s2642_s15 = scalar_lea.vmem %s51_s14, 256  ;;  %p2647_p11 = scmp.lt.s32.totalorder %s51_s14, %s51_s14 }
  0x1a   :  { %p2643_p10 = scmp.ne.s32.totalorder %s51_s14, %s2642_s15  ;;  %p2648_p12 = scmp.lt.s32.totalorder %s2642_s15, %s2642_s15 }
  0x1c   :  { %p2649_p13 = por %p2648_p12, %p2647_p11 }
  0x1e   :  { %p2650_p0 = pnand %p2649_p13, %p2643_p10 }
  0x20   :  { %2653 = shalt.err (!%p2650_p0)
}
  0x21   :  { %56 = dma.hbm_to_vmem [thread:$0]  %s3178_s5, 256, %s51_s14, [#allocation6], %s2682_s29, %s2682_s29, %s2683_s30  }
  0x22   :  { %2674 = dma.done.wait [#allocation3], 128  }
  0x23   :  { %2675 = vsyncadd [#allocation3], 4294967168 }
  0x24   :  { %2676 = dma.done.wait [#allocation6], 512  }
  0x25   :  { %2677 = vsyncadd [#allocation6], 4294966784  ;;  %v2369_v0 = vld [vmem:[#allocation2] sm:$0xff]   ;;  %vm75_vm0 = vcmask 261120   ;;  %v2554_v15 = vld [vmem:[#allocation5 + $0x8] sm:$0xff]   ;;  %v2685_v16 = vmov 0.0   ;;  %v202_v44 = vlaneseq }
  0x26   :  { %v2755_v1 = vunpack.c.l.bf16 %v2369_v0  ;;  %v2757_v2 = vunpack.c.h.bf16 %v2369_v0  ;;  %2410 = vmatprep.subr.bf16.mxu0 %v2685_v16  ;;  %vm2686_vm1 = vmmov 0   ;;  %v2555_v17 = vld [vmem:[#allocation5] sm:$0xff]   ;;  %2418 = vmatprep.subr.bf16.mxu1 %v2685_v16  ;;  %v2326_v26 = vld [vmem:[%s3174_s1] ss:$0 sm:$0xff]  ;;  %s2687_s1 = smov 112   ;;  %s2689_s21 = smov 104  }
  0x27   :  { %2414 = vmatprep.mubr.msk.bf16.mxu0 %vm2686_vm1, %v2685_v16  ;;  %2411 = vmatpush3.bf16.msra.mxu0 %v2554_v15  ;;  %v2327_v30 = vld [vmem:[%s3175_s2] ss:$0 sm:$0xff]  ;;  %s2688_s2 = smov 120   ;;  %s2690_s22 = smov 96   ;;  %v2691_v42 = vmov 1983009808  }
  0x28   :  { %v76_v3 = vsel %vm75_vm0, %v2755_v1, 0.0  ;;  %v79_v4 = vsel %vm75_vm0, %v2757_v2, 0.0  ;;  %2412 = vmatprep.subr.bf16.mxu0 %v2685_v16  ;;  %2420 = vmatprep.mubr.msk.bf16.mxu1 %vm2686_vm1, %v2685_v16  ;;  %v2328_v35 = vld [vmem:[%s3177_s4] ss:$0 sm:$0xff]  ;;  %v200_v43 = vunpack.c.l.s4 %v2691_v42  ;;  %v2692_v45 = vmov 1934713408  }
  0x29   :  { %77 = vadd.xlane.f32.xlu0 %v76_v3  ;;  %v232_v46 = vunpack.c.l.s4 %v2692_v45  ;;  %v203_v48 = vshrl.u32 %v202_v44, 7  ;;  %vm641_vm2 = vcmask 64512   ;;  %vm869_vm3 = vcmask 1043456   ;;  %s2693_s4 = smov 16   ;;  %s2694_s23 = smov 8  }
  0x2a   :  { %v201_v47 = vunpack.c.0.s8 %v200_v43  ;;  %s2695_s24 = smov 24   ;;  %vm1208_vm4 = vcmask 130048   ;;  %vm1210_vm5 = vcmask 195584   ;;  %vm2305_vm6 = vcmask 257024   ;;  %s2696_s27 = smov [#allocation8]  }
  0x2b   :  { %2413 = vmatpush3.bf16.msra.mxu0 %v2555_v17  ;;  %v233_v51 = vunpack.c.0.s8 %v232_v46  ;;  %s2313_s28 = sshll.u32 %s2696_s27, 4  ;;  %s2314_s28 = int_to_ptr.vmem [resolvable:$true] %s2313_s28 }
  0x2c   :  { %2424 = vmatprep.subr.bf16.mxu0 %v2685_v16  ;;  %v2794_v52 = vsub.s32 %v201_v47, %v203_v48  ;;  %s2654_s8 = scalar_lea.vmem %s2314_s28, 128  ;;  %p2659_p2 = scmp.lt.s32.totalorder %s2314_s28, %s2314_s28 }
  0x2d   :  { %80 = vadd.xlane.f32.xlu0 %v79_v4  ;;  %v2798_v58 = vsub.s32 %v233_v51, %v203_v48  ;;  %p2655_p1 = scmp.ne.s32.totalorder %s2314_s28, %s2654_s8  ;;  %p2660_p3 = scmp.lt.s32.totalorder %s2654_s8, %s2654_s8 }
  0x2f   :  { %p2661_p4 = por %p2660_p3, %p2659_p2 }
  0x31   :  { %p2662_p5 = pnand %p2661_p4, %p2655_p1 }
  0xb2   :  { %v78_v5 = vpop.xlane.xlu0 %77 }
  0xb3   :  { %v83_v6 = vmul.f32 0.03125, %v78_v5 }
  0xb5   :  { %v85_v7 = vsub.f32 %v2755_v1, %v83_v6 }
  0xb6   :  { %v81_v8 = vpop.xlane.xlu0 %80 }
  0xb7   :  { %v84_v9 = vmul.f32 0.03125, %v81_v8  ;;  %v87_v10 = vmul.f32 %v85_v7, %v85_v7 }
  0xb9   :  { %v86_v11 = vsub.f32 %v2757_v2, %v84_v9  ;;  %v89_v12 = vsel %vm75_vm0, %v87_v10, 0.0 }
  0xba   :  { %90 = vadd.xlane.f32.xlu1 %v89_v12 }
  0xbb   :  { %v88_v13 = vmul.f32 %v86_v11, %v86_v11 }
  0xbd   :  { %v92_v14 = vsel %vm75_vm0, %v88_v13, 0.0 }
  0xbe   :  { %93 = vadd.xlane.f32.xlu1 %v92_v14 }
 0x143   :  { %v91_v18 = vpop.xlane.xlu1 %90 }
 0x144   :  { %v95_v19 = vmul.f32 0.03125, %v91_v18 }
 0x146   :  { %v97_v20 = vadd.f32 1e-05, %v95_v19 }
 0x147   :  { %v94_v21 = vpop.xlane.xlu1 %93 }
 0x148   :  { %2558 = vrsqrt.f32 %v97_v20  ;;  %v96_v22 = vmul.f32 0.03125, %v94_v21 }
 0x14a   :  { %v98_v23 = vadd.f32 1e-05, %v96_v22 }
 0x14c   :  { %2560 = vrsqrt.f32 %v98_v23 }
 0x155   :  { %v2559_v24 = vpop.eup %2558 }
 0x156   :  { %v101_v25 = vmul.f32 %v2559_v24, %v85_v7 }
 0x158   :  { %v109_v29 = vmul.f32 %v2326_v26, %v101_v25 }
 0x159   :  { %v2561_v27 = vpop.eup %2560 }
 0x15a   :  { %v102_v28 = vmul.f32 %v2561_v27, %v86_v11  ;;  %v117_v32 = vadd.f32 %v2327_v30, %v109_v29 }
 0x15c   :  { %v110_v31 = vmul.f32 %v2326_v26, %v102_v28 }
 0x15e   :  { %v118_v33 = vadd.f32 %v2327_v30, %v110_v31 }
 0x160   :  { %v119_v34 = vpack.c.bf16 %v118_v33, %v117_v32 }
 0x162   :  { %2415 = vmatmul.mubr.msk.bf16.vlgmr.msra.gmra.mxu0 %vm75_vm0, %v119_v34 }
 0x163   :  { %2426 = vmatprep.mubr.msk.bf16.mxu0 %vm2686_vm1, %v2685_v16 }
 0x222   :  { %v180_v36 = vpop.f32.mrf.mxu0 }
 0x223   :  { %v181_v37 = vadd.f32 %v2328_v35, %v180_v36 }
 0x224   :  { %v2416_v38 = vpop.f32.mrf.mxu0 }
 0x225   :  { %191 = vrot.lane.b32.xlu1 %v181_v37, %s2687_s1  ;;  %188 = vrot.lane.b32.xlu0 %v181_v37, %s2688_s2 }
 0x226   :  { %v183_v39 = vpop.f32.mrf.mxu0 }
 0x227   :  { %v2788_v40 = vadd.f32 %v2328_v35, %v183_v39 }
 0x228   :  { %v2417_v41 = vpop.f32.mrf.mxu0 }
 0x229   :  { %194 = vrot.lane.b32.xlu1 %v181_v37, %s2689_s21 }
 0x22d   :  { %337 = vrot.lane.b32.xlu1 %v181_v37, %s2690_s22 }
 0x297   :  { %v192_v49 = vpop.permute.xlu1 %191  ;;  %v189_v50 = vpop.permute.xlu0 %188 }
 0x298   :  { %341 = vrot.lane.b32.xlu1 %v192_v49, %s2690_s22  ;;  %339 = vrot.lane.b32.xlu0 %v189_v50, %s2690_s22  ;;  %v197_v53 = vcombine.low %v181_v37, %v192_v49  ;;  %v198_v54 = vcombine.high %v181_v37, %v192_v49 }
 0x29a   :  { %v205_v59 = vrot.slane %v197_v53, %v2794_v52  ;;  %v212_v60 = vrot.slane %v198_v54, %v2794_v52 }
 0x29b   :  { %v195_v55 = vpop.permute.xlu1 %194 }
 0x29c   :  { %v213_v56 = vcombine.low %v189_v50, %v195_v55  ;;  %v214_v57 = vcombine.high %v189_v50, %v195_v55  ;;  %343 = vrot.lane.b32.xlu0 %v195_v55, %s2690_s22  ;;  %1213 = vrot.lane.b32.xlu1 %v2788_v40, %s2688_s2 }
 0x29e   :  { %v221_v61 = vrot.slane %v213_v56, %v2794_v52  ;;  %v228_v62 = vrot.slane %v214_v57, %v2794_v52 }
 0x29f   :  { %v338_v30 = vpop.permute.xlu1 %337 }
 0x2a0   :  { %v229_v63 = vcombine.low %v205_v59, %v221_v61  ;;  %v230_v0 = vcombine.high %v205_v59, %v221_v61  ;;  %v245_v3 = vcombine.low %v212_v60, %v228_v62  ;;  %v246_v4 = vcombine.high %v212_v60, %v228_v62  ;;  %1216 = vrot.lane.b32.xlu0 %v2788_v40, %s2687_s1 }
 0x2a1   :  { %1219 = vrot.lane.b32.xlu1 %v2788_v40, %s2689_s21 }
 0x2a2   :  { %v237_v5 = vrot.slane %v229_v63, %v2798_v58  ;;  %v244_v6 = vrot.slane %v230_v0, %v2798_v58  ;;  %v253_v7 = vrot.slane %v245_v3, %v2798_v58  ;;  %v260_v8 = vrot.slane %v246_v4, %v2798_v58 }
 0x2a4   :  { %v265_v9 = vcombine.low %v237_v5, %v244_v6  ;;  %v2332_v10 = vcombine.high %v237_v5, %v244_v6  ;;  %v281_v11 = vcombine.low %v253_v7, %v260_v8  ;;  %v2333_v12 = vcombine.high %v253_v7, %v260_v8  ;;  %489 = vrot.lane.b32.xlu0 %v181_v37, %s2682_s29 }
 0x2a5   :  { %491 = vrot.lane.b32.xlu1 %v189_v50, %s2682_s29 }
 0x2a6   :  { %v272_v13 = vrot.slane %v265_v9, %v2794_v52  ;;  %v280_v14 = vrot.slane %v2332_v10, %v2794_v52  ;;  %v288_v15 = vrot.slane %v281_v11, %v2794_v52  ;;  %v296_v17 = vrot.slane %v2333_v12, %v2794_v52 }
 0x2a8   :  { %1362 = vrot.lane.b32.xlu0 %v2788_v40, %s2690_s22  ;;  %v297_v18 = vcombine.low %v272_v13, %v280_v14  ;;  %v298_v19 = vcombine.high %v272_v13, %v280_v14  ;;  %v313_v20 = vcombine.low %v288_v15, %v296_v17  ;;  %v314_v21 = vcombine.high %v288_v15, %v296_v17 }
 0x2a9   :  { %495 = vrot.lane.b32.xlu1 %v195_v55, %s2682_s29 }
 0x2aa   :  { %v305_v22 = vrot.slane %v297_v18, %v2798_v58  ;;  %v321_v23 = vrot.slane %v313_v20, %v2798_v58  ;;  %v312_v24 = vrot.slane %v298_v19, %v2798_v58  ;;  %v328_v25 = vrot.slane %v314_v21, %v2798_v58 }
 0x2ac   :  { %493 = vrot.lane.b32.xlu0 %v192_v49, %s2682_s29  ;;  %v2826_v26 = vcombine.low %v305_v22, %v321_v23  ;;  %v2828_v27 = vcombine.high %v305_v22, %v321_v23  ;;  %v2830_v28 = vcombine.low %v312_v24, %v328_v25  ;;  %v2832_v29 = vcombine.high %v312_v24, %v328_v25 }
 0x30a   :  { %v342_v31 = vpop.permute.xlu1 %341  ;;  %v340_v32 = vpop.permute.xlu0 %339 }
 0x30b   :  { %v349_v33 = vcombine.low %v338_v30, %v342_v31  ;;  %v350_v34 = vcombine.high %v338_v30, %v342_v31 }
 0x30d   :  { %v357_v39 = vrot.slane %v349_v33, %v2794_v52  ;;  %v364_v41 = vrot.slane %v350_v34, %v2794_v52 }
 0x30e   :  { %v344_v35 = vpop.permute.xlu0 %343  ;;  %v2834_v36 = vpop.permute.xlu1 %1213 }
 0x30f   :  { %v365_v37 = vcombine.low %v340_v32, %v344_v35  ;;  %v366_v38 = vcombine.high %v340_v32, %v344_v35  ;;  %1364 = vrot.lane.b32.xlu1 %v2834_v36, %s2690_s22 }
 0x311   :  { %v373_v42 = vrot.slane %v365_v37, %v2794_v52  ;;  %v380_v43 = vrot.slane %v366_v38, %v2794_v52 }
 0x312   :  { %v2842_v44 = vpop.permute.xlu0 %1216 }
 0x313   :  { %v381_v45 = vcombine.low %v357_v39, %v373_v42  ;;  %v382_v46 = vcombine.high %v357_v39, %v373_v42  ;;  %v397_v47 = vcombine.low %v364_v41, %v380_v43  ;;  %v398_v48 = vcombine.high %v364_v41, %v380_v43  ;;  %v2844_v49 = vpop.permute.xlu1 %1219 }
 0x315   :  { %v389_v50 = vrot.slane %v381_v45, %v2798_v58  ;;  %v396_v51 = vrot.slane %v382_v46, %v2798_v58  ;;  %v405_v53 = vrot.slane %v397_v47, %v2798_v58  ;;  %v412_v54 = vrot.slane %v398_v48, %v2798_v58 }
 0x316   :  { %v490_v55 = vpop.permute.xlu0 %489 }
 0x317   :  { %v417_v56 = vcombine.low %v389_v50, %v396_v51  ;;  %v2334_v57 = vcombine.high %v389_v50, %v396_v51  ;;  %v433_v59 = vcombine.low %v405_v53, %v412_v54  ;;  %v2335_v60 = vcombine.high %v405_v53, %v412_v54  ;;  %v492_v61 = vpop.permute.xlu1 %491 }
 0x319   :  { %v424_v62 = vrot.slane %v417_v56, %v2794_v52  ;;  %v432_v63 = vrot.slane %v2334_v57, %v2794_v52  ;;  %v440_v0 = vrot.slane %v433_v59, %v2794_v52  ;;  %v448_v3 = vrot.slane %v2335_v60, %v2794_v52 }
 0x31a   :  { %v2854_v4 = vpop.permute.xlu0 %1362  ;;  %v333_v60 = vpack.c.bf16 %v2826_v26, %v2826_v26 }
 0x31b   :  { %v496_v5 = vpop.permute.xlu1 %495  ;;  %v449_v6 = vcombine.low %v424_v62, %v432_v63  ;;  %v465_v7 = vcombine.low %v440_v0, %v448_v3  ;;  %v450_v8 = vcombine.high %v424_v62, %v432_v63  ;;  %v466_v9 = vcombine.high %v440_v0, %v448_v3 }
 0x31c   :  { %v517_v10 = vcombine.low %v492_v61, %v496_v5  ;;  %v518_v11 = vcombine.high %v492_v61, %v496_v5  ;;  %v334_v61 = vpack.c.bf16 %v2828_v27, %v2828_v27 }
 0x31d   :  { %v457_v12 = vrot.slane %v449_v6, %v2798_v58  ;;  %v473_v13 = vrot.slane %v465_v7, %v2798_v58  ;;  %v464_v20 = vrot.slane %v450_v8, %v2798_v58  ;;  %v480_v21 = vrot.slane %v466_v9, %v2798_v58 }
 0x31e   :  { %v494_v14 = vpop.permute.xlu0 %493  ;;  %v525_v22 = vrot.slane %v517_v10, %v2794_v52  ;;  %v532_v23 = vrot.slane %v518_v11, %v2794_v52 }
 0x31f   :  { %v501_v15 = vcombine.low %v490_v55, %v494_v14  ;;  %v502_v17 = vcombine.high %v490_v55, %v494_v14  ;;  %v481_v18 = vcombine.low %v457_v12, %v473_v13  ;;  %v482_v19 = vcombine.high %v457_v12, %v473_v13 }
 0x320   :  { %v483_v39 = vcombine.low %v464_v20, %v480_v21  ;;  %v484_v41 = vcombine.high %v464_v20, %v480_v21 }
 0x321   :  { %v509_v24 = vrot.slane %v501_v15, %v2794_v52  ;;  %v516_v25 = vrot.slane %v502_v17, %v2794_v52  ;;  %v485_v30 = vpack.c.bf16 %v481_v18, %v481_v18  ;;  %v486_v31 = vpack.c.bf16 %v482_v19, %v482_v19 }
 0x322   :  { %v487_v53 = vpack.c.bf16 %v483_v39, %v483_v39  ;;  %v488_v54 = vpack.c.bf16 %v484_v41, %v484_v41  ;;  %v335_v15 = vpack.c.bf16 %v2830_v28, %v2830_v28  ;;  %v336_v17 = vpack.c.bf16 %v2832_v29, %v2832_v29 }
 0x323   :  { %v533_v32 = vcombine.low %v509_v24, %v525_v22  ;;  %v534_v33 = vcombine.high %v509_v24, %v525_v22  ;;  %v549_v34 = vcombine.low %v516_v25, %v532_v23  ;;  %v550_v35 = vcombine.high %v516_v25, %v532_v23 }
 0x324   :  { %v646_v37 = vsel %vm641_vm2, %v485_v30, 0  ;;  %v692_v38 = vsel %vm641_vm2, %v486_v31, 0  ;;  %v738_v5 = vsel %vm641_vm2, %v487_v53, 0  ;;  %v784_v6 = vsel %vm641_vm2, %v488_v54, 0 }
 0x325   :  { %v541_v42 = vrot.slane %v533_v32, %v2798_v58  ;;  %v548_v43 = vrot.slane %v534_v33, %v2798_v58  ;;  %v557_v45 = vrot.slane %v549_v34, %v2798_v58  ;;  %v564_v46 = vrot.slane %v550_v35, %v2798_v58  ;;  %2419 = vmatpush3.bf16.xpose.msra.mxu1 %v646_v37 }
 0x326   :  { %2425 = vmatpush3.bf16.xpose.msra.mxu0 %v692_v38  ;;  %2430 = vmatprep.subr.bf16.mxu1 %v2685_v16  ;;  %v1223_v54 = vcombine.high %v2788_v40, %v2842_v44 }
 0x327   :  { %v569_v47 = vcombine.low %v541_v42, %v548_v43  ;;  %v2336_v48 = vcombine.high %v541_v42, %v548_v43  ;;  %v585_v50 = vcombine.low %v557_v45, %v564_v46  ;;  %v2337_v51 = vcombine.high %v557_v45, %v564_v46  ;;  %2436 = vmatprep.subr.bf16.mxu0 %v2685_v16 }
 0x328   :  { %v1222_v46 = vcombine.low %v2788_v40, %v2842_v44 }
 0x329   :  { %v576_v55 = vrot.slane %v569_v47, %v2794_v52  ;;  %v584_v56 = vrot.slane %v2336_v48, %v2794_v52  ;;  %v592_v57 = vrot.slane %v585_v50, %v2794_v52  ;;  %v600_v59 = vrot.slane %v2337_v51, %v2794_v52 }
 0x32a   :  { %v1238_v47 = vcombine.low %v2834_v36, %v2844_v49 }
 0x32b   :  { %v601_v62 = vcombine.low %v576_v55, %v584_v56  ;;  %v617_v63 = vcombine.low %v592_v57, %v600_v59  ;;  %v602_v0 = vcombine.high %v576_v55, %v584_v56  ;;  %v618_v3 = vcombine.high %v592_v57, %v600_v59 }
 0x32c   :  { %2421 = vmatmul.mubr.msk.bf16.vlgmr.msra.gmra.mxu1 %vm641_vm2, %v333_v60  ;;  %v1239_v55 = vcombine.high %v2834_v36, %v2844_v49  ;;  %v1230_v57 = vrot.slane %v1222_v46, %v2794_v52  ;;  %v1246_v59 = vrot.slane %v1238_v47, %v2794_v52 }
 0x32d   :  { %2427 = vmatmul.mubr.msk.bf16.vlgmr.msra.gmra.mxu0 %vm641_vm2, %v334_v61  ;;  %2431 = vmatpush3.bf16.xpose.msra.mxu1 %v738_v5  ;;  %v609_v7 = vrot.slane %v601_v62, %v2798_v58  ;;  %v625_v26 = vrot.slane %v617_v63, %v2798_v58  ;;  %v616_v8 = vrot.slane %v602_v0, %v2798_v58 }
 0x32e   :  { %2437 = vmatpush3.bf16.xpose.msra.mxu0 %v784_v6  ;;  %2432 = vmatprep.mubr.msk.bf16.mxu1 %vm2686_vm1, %v2685_v16  ;;  %v632_v27 = vrot.slane %v618_v3, %v2798_v58  ;;  %v1237_v61 = vrot.slane %v1223_v54, %v2794_v52  ;;  %v1253_v62 = vrot.slane %v1239_v55, %v2794_v52 }
 0x32f   :  { %2438 = vmatprep.mubr.msk.bf16.mxu0 %vm2686_vm1, %v2685_v16  ;;  %2442 = vmatprep.subr.bf16.mxu1 %v2685_v16  ;;  %v633_v9 = vcombine.low %v609_v7, %v625_v26  ;;  %v634_v10 = vcombine.high %v609_v7, %v625_v26  ;;  %v1254_v63 = vcombine.low %v1230_v57, %v1246_v59 }
 0x330   :  { %2448 = vmatprep.subr.bf16.mxu0 %v2685_v16  ;;  %v2894_v11 = vcombine.low %v616_v8, %v632_v27  ;;  %v2896_v12 = vcombine.high %v616_v8, %v632_v27  ;;  %v1255_v3 = vcombine.high %v1230_v57, %v1246_v59  ;;  %v1270_v7 = vcombine.low %v1237_v61, %v1253_v62 }
 0x331   :  { %v637_v13 = vpack.c.bf16 %v633_v9, %v633_v9  ;;  %v638_v14 = vpack.c.bf16 %v634_v10, %v634_v10  ;;  %v1262_v8 = vrot.slane %v1254_v63, %v2798_v58 }
 0x332   :  { %v1269_v10 = vrot.slane %v1255_v3, %v2798_v58 }
 0x333   :  { %v871_v18 = vsel %vm869_vm3, %v637_v13, 0  ;;  %v917_v19 = vsel %vm869_vm3, %v638_v14, 0 }
 0x334   :  { %2433 = vmatmul.mubr.msk.bf16.vlgmr.msra.gmra.mxu1 %vm641_vm2, %v335_v15 }
 0x335   :  { %2439 = vmatmul.mubr.msk.bf16.vlgmr.msra.gmra.mxu0 %vm641_vm2, %v336_v17  ;;  %2443 = vmatpush3.bf16.msra.mxu1 %v871_v18 }
 0x336   :  { %2449 = vmatpush3.bf16.msra.mxu0 %v917_v19  ;;  %2444 = vmatprep.mubr.msk.bf16.mxu1 %vm2686_vm1, %v2685_v16  ;;  %v1278_v19 = vrot.slane %v1270_v7, %v2798_v58 }
 0x337   :  { %2450 = vmatprep.mubr.msk.bf16.mxu0 %vm2686_vm1, %v2685_v16  ;;  %2454 = vmatprep.subr.bf16.mxu1 %v2685_v16 }
 0x338   :  { %2460 = vmatprep.subr.bf16.mxu0 %v2685_v16 }
 0x381   :  { %v1365_v45 = vpop.permute.xlu1 %1364 }
 0x3ec   :  { %v682_v28 = vpop.f32.mrf.mxu1 }
 0x3ed   :  { %v728_v29 = vpop.f32.mrf.mxu0  ;;  %v826_v20 = vsel %vm641_vm2, %v682_v28, -inf }
 0x3ee   :  { %v2422_v21 = vpop.f32.mrf.mxu1  ;;  %827 = vmax.xlane.f32.xlu0 %v826_v20  ;;  %v829_v22 = vsel %vm641_vm2, %v728_v29, -inf }
 0x3ef   :  { %830 = vmax.xlane.f32.xlu1 %v829_v22  ;;  %v2428_v23 = vpop.f32.mrf.mxu0 }
 0x3f0   :  { %v685_v24 = vpop.f32.mrf.mxu1  ;;  %v1290_v23 = vcombine.low %v1262_v8, %v1269_v10 }
 0x3f1   :  { %v731_v25 = vpop.f32.mrf.mxu0  ;;  %v2348_v24 = vcombine.high %v1262_v8, %v1269_v10 }
 0x3f2   :  { %v2423_v30 = vpop.f32.mrf.mxu1 }
 0x3f3   :  { %v2429_v31 = vpop.f32.mrf.mxu0 }
 0x3f4   :  { %v774_v32 = vpop.f32.mrf.mxu1 }
 0x3f5   :  { %v820_v33 = vpop.f32.mrf.mxu0  ;;  %v832_v34 = vsel %vm641_vm2, %v774_v32, -inf }
 0x3f6   :  { %v2434_v35 = vpop.f32.mrf.mxu1  ;;  %833 = vmax.xlane.f32.xlu0 %v832_v34  ;;  %v835_v37 = vsel %vm641_vm2, %v820_v33, -inf }
 0x3f7   :  { %836 = vmax.xlane.f32.xlu1 %v835_v37  ;;  %v2440_v38 = vpop.f32.mrf.mxu0 }
 0x3f8   :  { %v777_v39 = vpop.f32.mrf.mxu1 }
 0x3f9   :  { %v823_v41 = vpop.f32.mrf.mxu0  ;;  %v640_v39 = vpack.c.bf16 %v2896_v12, %v2896_v12 }
 0x3fa   :  { %v2435_v42 = vpop.f32.mrf.mxu1 }
 0x3fb   :  { %v2441_v43 = vpop.f32.mrf.mxu0 }
 0x408   :  { %1368 = vrot.lane.b32.xlu1 %v2844_v49, %s2690_s22 }
 0x40c   :  { %1516 = vrot.lane.b32.xlu1 %v2834_v36, %s2682_s29  ;;  %1366 = vrot.lane.b32.xlu0 %v2842_v44, %s2690_s22  ;;  %v1271_v36 = vcombine.high %v1237_v61, %v1253_v62 }
 0x410   :  { %1514 = vrot.lane.b32.xlu0 %v2788_v40, %s2682_s29 }
 0x477   :  { %v828_v48 = vpop.xlane.xlu0 %827 }
 0x478   :  { %v838_v50 = vsub.f32 %v682_v28, %v828_v48  ;;  %v831_v51 = vpop.xlane.xlu1 %830  ;;  %v1285_v28 = vrot.slane %v1271_v36, %v2798_v58 }
 0x479   :  { %v839_v53 = vsub.f32 %v728_v29, %v831_v51 }
 0x47a   :  { %v842_v56 = vmul.f32 1.442695, %v838_v50  ;;  %v1306_v35 = vcombine.low %v1278_v19, %v1285_v28  ;;  %v2349_v37 = vcombine.high %v1278_v19, %v1285_v28 }
 0x47b   :  { %v844_v60 = vmul.f32 1.442695, %v839_v53  ;;  %v1305_v53 = vrot.slane %v2348_v24, %v2794_v52 }
 0x47c   :  { %2562 = vpow2.f32 %v842_v56  ;;  %v1313_v54 = vrot.slane %v1306_v35, %v2794_v52  ;;  %v1321_v55 = vrot.slane %v2349_v37, %v2794_v52  ;;  %v1009_v56 = vsel %vm869_vm3, %v640_v39, 0 }
 0x47d   :  { %2564 = vpow2.f32 %v844_v60 }
 0x47e   :  { %v1338_v36 = vcombine.low %v1313_v54, %v1321_v55 }
 0x47f   :  { %v834_v0 = vpop.xlane.xlu0 %833 }
 0x480   :  { %v840_v5 = vsub.f32 %v774_v32, %v834_v0  ;;  %v837_v40 = vpop.xlane.xlu1 %836 }
 0x481   :  { %v841_v6 = vsub.f32 %v820_v33, %v837_v40 }
 0x482   :  { %v846_v26 = vmul.f32 1.442695, %v840_v5 }
 0x483   :  { %v848_v27 = vmul.f32 1.442695, %v841_v6  ;;  %v1367_v9 = vpop.permute.xlu0 %1366 }
 0x484   :  { %2566 = vpow2.f32 %v846_v26  ;;  %v1374_v13 = vcombine.low %v2854_v4, %v1367_v9  ;;  %v1375_v14 = vcombine.high %v2854_v4, %v1367_v9  ;;  %v1369_v15 = vpop.permute.xlu1 %1368  ;;  %v639_v4 = vpack.c.bf16 %v2894_v11, %v2894_v11 }
 0x485   :  { %2568 = vpow2.f32 %v848_v27  ;;  %v1390_v17 = vcombine.low %v1365_v45, %v1369_v15  ;;  %v1391_v18 = vcombine.high %v1365_v45, %v1369_v15  ;;  %v2961_v45 = vrot.slane %v1290_v23, %v2794_v52 }
 0x486   :  { %v1382_v29 = vrot.slane %v1374_v13, %v2794_v52  ;;  %v1389_v20 = vrot.slane %v1375_v14, %v2794_v52  ;;  %v963_v47 = vsel %vm869_vm3, %v639_v4, 0  ;;  %v1339_v4 = vcombine.high %v1313_v54, %v1321_v55 }
 0x487   :  { %v1398_v21 = vrot.slane %v1390_v17, %v2794_v52  ;;  %v1405_v22 = vrot.slane %v1391_v18, %v2794_v52  ;;  %v1322_v7 = vcombine.low %v2961_v45, %v1305_v53  ;;  %v1346_v17 = vrot.slane %v1338_v36, %v2798_v58 }
 0x488   :  { %v1323_v24 = vcombine.high %v2961_v45, %v1305_v53  ;;  %v1353_v37 = vrot.slane %v1339_v4, %v2798_v58 }
 0x489   :  { %v2948_v25 = vpop.eup %2562  ;;  %v1406_v30 = vcombine.low %v1382_v29, %v1398_v21  ;;  %v1407_v31 = vcombine.high %v1382_v29, %v1398_v21  ;;  %v1422_v32 = vcombine.low %v1389_v20, %v1405_v22  ;;  %v1423_v33 = vcombine.high %v1389_v20, %v1405_v22 }
 0x48a   :  { %v2950_v34 = vpop.eup %2564  ;;  %v862_v38 = vpack.c.bf16 %v2948_v25, %v2948_v25  ;;  %v1330_v15 = vrot.slane %v1322_v7, %v2798_v58  ;;  %v1337_v35 = vrot.slane %v1323_v24, %v2798_v58  ;;  %v1517_v24 = vpop.permute.xlu1 %1516 }
 0x48b   :  { %v1414_v41 = vrot.slane %v1406_v30, %v2798_v58  ;;  %v1421_v11 = vrot.slane %v1407_v31, %v2798_v58  ;;  %v1430_v42 = vrot.slane %v1422_v32, %v2798_v58  ;;  %v1437_v43 = vrot.slane %v1423_v33, %v2798_v58 }
 0x48c   :  { %2445 = vmatmul.mubr.msk.bf16.vlgmr.msra.gmra.mxu1 %vm641_vm2, %v862_v38  ;;  %v863_v46 = vpack.c.bf16 %v2950_v34, %v2950_v34  ;;  %v1354_v22 = vcombine.low %v1330_v15, %v1346_v17  ;;  %v1355_v23 = vcombine.high %v1330_v15, %v1346_v17 }
 0x48d   :  { %v1442_v48 = vcombine.low %v1414_v41, %v1421_v11  ;;  %v2350_v12 = vcombine.high %v1414_v41, %v1421_v11  ;;  %v1458_v50 = vcombine.low %v1430_v42, %v1437_v43  ;;  %v2351_v51 = vcombine.high %v1430_v42, %v1437_v43  ;;  %2455 = vmatpush3.bf16.msra.mxu1 %v963_v47 }
 0x48e   :  { %2451 = vmatmul.mubr.msk.bf16.vlgmr.msra.gmra.mxu0 %vm641_vm2, %v863_v46  ;;  %2456 = vmatprep.mubr.msk.bf16.mxu1 %vm2686_vm1, %v2685_v16  ;;  %v1358_v32 = vpack.c.bf16 %v1354_v22, %v1354_v22  ;;  %v1359_v33 = vpack.c.bf16 %v1355_v23, %v1355_v23  ;;  %v1356_v41 = vcombine.low %v1337_v35, %v1353_v37  ;;  %v1515_v23 = vpop.permute.xlu0 %1514 }
 0x48f   :  { %v1449_v57 = vrot.slane %v1442_v48, %v2794_v52  ;;  %v1457_v59 = vrot.slane %v2350_v12, %v2794_v52  ;;  %v1465_v60 = vrot.slane %v1458_v50, %v2794_v52  ;;  %v1473_v61 = vrot.slane %v2351_v51, %v2794_v52  ;;  %2461 = vmatpush3.bf16.msra.mxu0 %v1009_v56 }
 0x490   :  { %2462 = vmatprep.mubr.msk.bf16.mxu0 %vm2686_vm1, %v2685_v16  ;;  %2466 = vmatprep.subr.bf16.mxu1 %v2685_v16  ;;  %v1357_v11 = vcombine.high %v1337_v35, %v1353_v37  ;;  %v1360_v42 = vpack.c.bf16 %v1356_v41, %v1356_v41 }
 0x491   :  { %v2981_v62 = vpop.eup %2566  ;;  %2472 = vmatprep.subr.bf16.mxu0 %v2685_v16  ;;  %v1474_v63 = vcombine.low %v1449_v57, %v1457_v59  ;;  %v1490_v0 = vcombine.low %v1465_v60, %v1473_v61  ;;  %v1475_v3 = vcombine.high %v1449_v57, %v1457_v59  ;;  %v1491_v5 = vcombine.high %v1465_v60, %v1473_v61 }
 0x492   :  { %v2984_v40 = vpop.eup %2568  ;;  %v864_v6 = vpack.c.bf16 %v2981_v62, %v2981_v62  ;;  %v1361_v43 = vpack.c.bf16 %v1357_v11, %v1357_v11 }
 0x493   :  { %v865_v26 = vpack.c.bf16 %v2984_v40, %v2984_v40  ;;  %v1482_v8 = vrot.slane %v1474_v63, %v2798_v58  ;;  %v1498_v27 = vrot.slane %v1490_v0, %v2798_v58  ;;  %v1489_v13 = vrot.slane %v1475_v3, %v2798_v58 }
 0x494   :  { %2457 = vmatmul.mubr.msk.bf16.vlgmr.msra.gmra.mxu1 %vm641_vm2, %v864_v6  ;;  %v1505_v14 = vrot.slane %v1491_v5, %v2798_v58  ;;  %v859_v22 = vsel %vm641_vm2, %v2984_v40, 0.0 }
 0x495   :  { %v1506_v9 = vcombine.low %v1482_v8, %v1498_v27  ;;  %v1507_v10 = vcombine.high %v1482_v8, %v1498_v27  ;;  %2468 = vmatprep.mubr.msk.bf16.mxu1 %vm2686_vm1, %v2685_v16 }
 0x496   :  { %2463 = vmatmul.mubr.msk.bf16.vlgmr.msra.gmra.mxu0 %vm641_vm2, %v865_v26  ;;  %v1508_v20 = vcombine.low %v1489_v13, %v1505_v14  ;;  %v1509_v21 = vcombine.high %v1489_v13, %v1505_v14 }
 0x497   :  { %v1510_v18 = vpack.c.bf16 %v1506_v9, %v1506_v9  ;;  %v1511_v19 = vpack.c.bf16 %v1507_v10, %v1507_v10  ;;  %2474 = vmatprep.mubr.msk.bf16.mxu0 %vm2686_vm1, %v2685_v16 }
 0x498   :  { %v1512_v30 = vpack.c.bf16 %v1508_v20, %v1508_v20  ;;  %v1513_v31 = vpack.c.bf16 %v1509_v21, %v1509_v21  ;;  %v850_v21 = vsel %vm641_vm2, %v2948_v25, 0.0 }
 0x499   :  { %v1670_v28 = vsel %vm641_vm2, %v1510_v18, 0  ;;  %v1716_v29 = vsel %vm641_vm2, %v1511_v19, 0 }
 0x49a   :  { %2467 = vmatpush3.bf16.xpose.msra.mxu1 %v1670_v28  ;;  %2473 = vmatpush3.bf16.xpose.msra.mxu0 %v1716_v29  ;;  %v1762_v38 = vsel %vm641_vm2, %v1512_v30, 0  ;;  %v1808_v39 = vsel %vm641_vm2, %v1513_v31, 0 }
 0x49b   :  { %2478 = vmatprep.subr.bf16.mxu1 %v2685_v16  ;;  %2484 = vmatprep.subr.bf16.mxu0 %v2685_v16 }
 0x4a1   :  { %2469 = vmatmul.mubr.msk.bf16.vlgmr.msra.gmra.mxu1 %vm641_vm2, %v1358_v32  ;;  %2475 = vmatmul.mubr.msk.bf16.vlgmr.msra.gmra.mxu0 %vm641_vm2, %v1359_v33 }
 0x4a2   :  { %2479 = vmatpush3.bf16.xpose.msra.mxu1 %v1762_v38  ;;  %2485 = vmatpush3.bf16.xpose.msra.mxu0 %v1808_v39 }
 0x4a3   :  { %2480 = vmatprep.mubr.msk.bf16.mxu1 %vm2686_vm1, %v2685_v16  ;;  %2486 = vmatprep.mubr.msk.bf16.mxu0 %vm2686_vm1, %v2685_v16 }
 0x4a4   :  { %2490 = vmatprep.subr.bf16.mxu1 %v2685_v16  ;;  %2496 = vmatprep.subr.bf16.mxu0 %v2685_v16 }
 0x4a9   :  { %2481 = vmatmul.mubr.msk.bf16.vlgmr.msra.gmra.mxu1 %vm641_vm2, %v1360_v42  ;;  %2487 = vmatmul.mubr.msk.bf16.vlgmr.msra.gmra.mxu0 %vm641_vm2, %v1361_v43 }
 0x4aa   :  { %2492 = vmatprep.mubr.msk.bf16.mxu1 %vm2686_vm1, %v2685_v16  ;;  %2498 = vmatprep.mubr.msk.bf16.mxu0 %vm2686_vm1, %v2685_v16 }
 0x54c   :  { %v3026_v45 = vpop.f32.mrf.mxu1 }
 0x54e   :  { %v3028_v46 = vpop.f32.mrf.mxu0  ;;  %v2446_v47 = vpop.f32.mrf.mxu1 }
 0x550   :  { %v2452_v48 = vpop.f32.mrf.mxu0  ;;  %v910_v12 = vpop.f32.mrf.mxu1 }
 0x552   :  { %v956_v50 = vpop.f32.mrf.mxu0  ;;  %v2447_v51 = vpop.f32.mrf.mxu1 }
 0x554   :  { %v2453_v53 = vpop.f32.mrf.mxu0  ;;  %v3030_v54 = vpop.f32.mrf.mxu1 }
 0x556   :  { %v3032_v55 = vpop.f32.mrf.mxu0  ;;  %v2458_v56 = vpop.f32.mrf.mxu1 }
 0x558   :  { %v2464_v57 = vpop.f32.mrf.mxu0  ;;  %v1002_v59 = vpop.f32.mrf.mxu1 }
 0x55a   :  { %v1048_v60 = vpop.f32.mrf.mxu0  ;;  %v2459_v61 = vpop.f32.mrf.mxu1 }
 0x55c   :  { %v2465_v63 = vpop.f32.mrf.mxu0 }
 0x561   :  { %v1706_v0 = vpop.f32.mrf.mxu1  ;;  %v1752_v3 = vpop.f32.mrf.mxu0 }
 0x562   :  { %v1850_v5 = vsel %vm641_vm2, %v1706_v0, -inf  ;;  %v1853_v6 = vsel %vm641_vm2, %v1752_v3, -inf }
 0x563   :  { %1851 = vmax.xlane.f32.xlu0 %v1850_v5  ;;  %v2470_v7 = vpop.f32.mrf.mxu1  ;;  %1854 = vmax.xlane.f32.xlu1 %v1853_v6  ;;  %v2476_v36 = vpop.f32.mrf.mxu0 }
 0x565   :  { %v1709_v26 = vpop.f32.mrf.mxu1  ;;  %v1755_v8 = vpop.f32.mrf.mxu0 }
 0x567   :  { %v2471_v27 = vpop.f32.mrf.mxu1  ;;  %v2477_v9 = vpop.f32.mrf.mxu0 }
 0x569   :  { %v3036_v10 = vpop.f32.mrf.mxu1  ;;  %v3038_v13 = vpop.f32.mrf.mxu0 }
 0x56a   :  { %v1856_v29 = vsel %vm641_vm2, %v3036_v10, -inf  ;;  %v1859_v20 = vsel %vm641_vm2, %v3038_v13, -inf }
 0x56b   :  { %v2482_v14 = vpop.f32.mrf.mxu1  ;;  %v2488_v15 = vpop.f32.mrf.mxu0 }
 0x56d   :  { %v1801_v17 = vpop.f32.mrf.mxu1  ;;  %v1847_v18 = vpop.f32.mrf.mxu0 }
 0x56f   :  { %v2483_v19 = vpop.f32.mrf.mxu1  ;;  %v2489_v28 = vpop.f32.mrf.mxu0 }
 0x574   :  { %1520 = vrot.lane.b32.xlu1 %v2844_v49, %s2682_s29  ;;  %v853_v49 = vsel %vm641_vm2, %v2950_v34, 0.0 }
 0x579   :  { %1518 = vrot.lane.b32.xlu0 %v2842_v44, %s2682_s29  ;;  %v856_v44 = vsel %vm641_vm2, %v2981_v62, 0.0 }
 0x598   :  { %1857 = vmax.xlane.f32.xlu0 %v1856_v29  ;;  %1860 = vmax.xlane.f32.xlu1 %v1859_v20 }
 0x59c   :  { %851 = vadd.xlane.f32.xlu0 %v850_v21  ;;  %860 = vadd.xlane.f32.xlu1 %v859_v22 }
 0x5a0   :  { %854 = vadd.xlane.f32.xlu0 %v853_v49 }
 0x5a4   :  { %857 = vadd.xlane.f32.xlu0 %v856_v44 }
 0x5ec   :  { %v1852_v4 = vpop.xlane.xlu0 %1851  ;;  %v1855_v30 = vpop.xlane.xlu1 %1854 }
 0x5ed   :  { %v1862_v31 = vsub.f32 %v1706_v0, %v1852_v4  ;;  %v1863_v32 = vsub.f32 %v1752_v3, %v1855_v30 }
 0x5ef   :  { %v1866_v25 = vmul.f32 1.442695, %v1862_v31  ;;  %v1868_v33 = vmul.f32 1.442695, %v1863_v32 }
 0x5f0   :  { %v1519_v35 = vpop.permute.xlu0 %1518  ;;  %v1521_v40 = vpop.permute.xlu1 %1520 }
 0x5f1   :  { %2570 = vpow2.f32 %v1866_v25  ;;  %v1526_v37 = vcombine.low %v1515_v23, %v1519_v35  ;;  %v1527_v38 = vcombine.high %v1515_v23, %v1519_v35  ;;  %v1542_v39 = vcombine.low %v1517_v24, %v1521_v40 }
 0x5f2   :  { %2572 = vpow2.f32 %v1868_v33  ;;  %v1543_v34 = vcombine.high %v1517_v24, %v1521_v40 }
 0x5f3   :  { %v1534_v41 = vrot.slane %v1526_v37, %v2794_v52  ;;  %v1541_v62 = vrot.slane %v1527_v38, %v2794_v52  ;;  %v1550_v11 = vrot.slane %v1542_v39, %v2794_v52 }
 0x5f4   :  { %v1557_v42 = vrot.slane %v1543_v34, %v2794_v52 }
 0x5f5   :  { %v1558_v43 = vcombine.low %v1534_v41, %v1550_v11  ;;  %v1559_v47 = vcombine.high %v1534_v41, %v1550_v11 }
 0x5f6   :  { %v1574_v48 = vcombine.low %v1541_v62, %v1557_v42  ;;  %v1575_v12 = vcombine.high %v1541_v62, %v1557_v42 }
 0x5f7   :  { %v1566_v50 = vrot.slane %v1558_v43, %v2798_v58  ;;  %v1573_v51 = vrot.slane %v1559_v47, %v2798_v58 }
 0x5f8   :  { %v1582_v53 = vrot.slane %v1574_v48, %v2798_v58  ;;  %v1589_v56 = vrot.slane %v1575_v12, %v2798_v58 }
 0x5f9   :  { %v1594_v57 = vcombine.low %v1566_v50, %v1573_v51  ;;  %v2352_v59 = vcombine.high %v1566_v50, %v1573_v51 }
 0x5fa   :  { %v1610_v60 = vcombine.low %v1582_v53, %v1589_v56  ;;  %v2353_v61 = vcombine.high %v1582_v53, %v1589_v56 }
 0x5fb   :  { %v1601_v63 = vrot.slane %v1594_v57, %v2794_v52  ;;  %v1609_v0 = vrot.slane %v2352_v59, %v2794_v52 }
 0x5fc   :  { %v1617_v3 = vrot.slane %v1610_v60, %v2794_v52  ;;  %v1625_v5 = vrot.slane %v2353_v61, %v2794_v52 }
 0x5fd   :  { %v1626_v6 = vcombine.low %v1601_v63, %v1609_v0  ;;  %v1627_v7 = vcombine.high %v1601_v63, %v1609_v0 }
 0x5fe   :  { %v2571_v36 = vpop.eup %2570  ;;  %v1642_v26 = vcombine.low %v1617_v3, %v1625_v5  ;;  %v1643_v8 = vcombine.high %v1617_v3, %v1625_v5 }
 0x5ff   :  { %v2573_v27 = vpop.eup %2572  ;;  %v1874_v9 = vsel %vm641_vm2, %v2571_v36, 0.0  ;;  %v1634_v14 = vrot.slane %v1626_v6, %v2798_v58  ;;  %v1641_v15 = vrot.slane %v1627_v7, %v2798_v58  ;;  %v1886_v30 = vpack.c.bf16 %v2571_v36, %v2571_v36 }
 0x600   :  { %1875 = vadd.xlane.f32.xlu0 %v1874_v9  ;;  %v1877_v17 = vsel %vm641_vm2, %v2573_v27, 0.0  ;;  %v1650_v18 = vrot.slane %v1642_v26, %v2798_v58  ;;  %v1657_v19 = vrot.slane %v1643_v8, %v2798_v58  ;;  %v1887_v31 = vpack.c.bf16 %v2573_v27, %v2573_v27 }
 0x601   :  { %1878 = vadd.xlane.f32.xlu1 %v1877_v17 }
 0x602   :  { %v1658_v28 = vcombine.low %v1634_v14, %v1650_v18  ;;  %v1659_v29 = vcombine.high %v1634_v14, %v1650_v18  ;;  %v1660_v20 = vcombine.low %v1641_v15, %v1657_v19  ;;  %v1661_v21 = vcombine.high %v1641_v15, %v1657_v19 }
 0x604   :  { %v1662_v22 = vpack.c.bf16 %v1658_v28, %v1658_v28  ;;  %v1663_v49 = vpack.c.bf16 %v1659_v29, %v1659_v29  ;;  %v1664_v24 = vpack.c.bf16 %v1660_v20, %v1660_v20  ;;  %v1665_v4 = vpack.c.bf16 %v1661_v21, %v1661_v21 }
 0x606   :  { %v1894_v44 = vsel %vm869_vm3, %v1662_v22, 0  ;;  %v1940_v23 = vsel %vm869_vm3, %v1663_v49, 0  ;;  %v1986_v32 = vsel %vm869_vm3, %v1664_v24, 0  ;;  %v2032_v25 = vsel %vm869_vm3, %v1665_v4, 0 }
 0x607   :  { %2491 = vmatpush3.bf16.msra.mxu1 %v1894_v44  ;;  %2497 = vmatpush3.bf16.msra.mxu0 %v1940_v23 }
 0x608   :  { %2502 = vmatprep.subr.bf16.mxu1 %v2685_v16  ;;  %2508 = vmatprep.subr.bf16.mxu0 %v2685_v16 }
 0x60a   :  { %2493 = vmatmul.mubr.msk.bf16.vlgmr.msra.gmra.mxu1 %vm641_vm2, %v1886_v30  ;;  %2499 = vmatmul.mubr.msk.bf16.vlgmr.msra.gmra.mxu0 %vm641_vm2, %v1887_v31 }
 0x60b   :  { %2503 = vmatpush3.bf16.msra.mxu1 %v1986_v32  ;;  %2509 = vmatpush3.bf16.msra.mxu0 %v2032_v25 }
 0x60c   :  { %2504 = vmatprep.mubr.msk.bf16.mxu1 %vm2686_vm1, %v2685_v16  ;;  %2510 = vmatprep.mubr.msk.bf16.mxu0 %vm2686_vm1, %v2685_v16 }
 0x60d   :  { %2514 = vmatprep.subr.bf16.mxu1 %v2685_v16 }
 0x621   :  { %v1858_v33 = vpop.xlane.xlu0 %1857  ;;  %v1861_v35 = vpop.xlane.xlu1 %1860 }
 0x622   :  { %v1864_v40 = vsub.f32 %v3036_v10, %v1858_v33  ;;  %v1865_v37 = vsub.f32 %v3038_v13, %v1861_v35 }
 0x624   :  { %v1870_v38 = vmul.f32 1.442695, %v1864_v40  ;;  %v1872_v39 = vmul.f32 1.442695, %v1865_v37 }
 0x625   :  { %v852_v34 = vpop.xlane.xlu0 %851  ;;  %v861_v41 = vpop.xlane.xlu1 %860 }
 0x626   :  { %2574 = vpow2.f32 %v1870_v38 }
 0x627   :  { %2576 = vpow2.f32 %v1872_v39 }
 0x628   :  { %2578 = vrcp.f32 %v861_v41 }
 0x629   :  { %v855_v62 = vpop.xlane.xlu0 %854 }
 0x62a   :  { %2580 = vrcp.f32 %v855_v62 }
 0x62b   :  { %2582 = vrcp.f32 %v852_v34 }
 0x62d   :  { %v858_v11 = vpop.xlane.xlu0 %857 }
 0x62e   :  { %2584 = vrcp.f32 %v858_v11 }
 0x633   :  { %v2575_v42 = vpop.eup %2574 }
 0x634   :  { %v2577_v43 = vpop.eup %2576  ;;  %v1880_v47 = vsel %vm641_vm2, %v2575_v42, 0.0  ;;  %v1888_v48 = vpack.c.bf16 %v2575_v42, %v2575_v42 }
 0x635   :  { %1881 = vadd.xlane.f32.xlu0 %v1880_v47  ;;  %v1883_v10 = vsel %vm641_vm2, %v2577_v43, 0.0  ;;  %v1889_v13 = vpack.c.bf16 %v2577_v43, %v2577_v43  ;;  %v2579_v12 = vpop.eup %2578 }
 0x636   :  { %1884 = vadd.xlane.f32.xlu1 %v1883_v10  ;;  %2505 = vmatmul.mubr.msk.bf16.vlgmr.msra.gmra.mxu1 %vm641_vm2, %v1888_v48  ;;  %v1058_v56 = vmul.f32 %v2579_v12, %v3032_v55 }
 0x637   :  { %v2581_v50 = vpop.eup %2580  ;;  %2511 = vmatmul.mubr.msk.bf16.vlgmr.msra.gmra.mxu0 %vm641_vm2, %v1889_v13  ;;  %2518 = vmatprep.mubr.msk.bf16.mxu1 %vm2686_vm1, %v2685_v16 }
 0x638   :  { %v1056_v51 = vmul.f32 %v2581_v50, %v3028_v46  ;;  %v2583_v53 = vpop.eup %2582 }
 0x639   :  { %v1055_v59 = vmul.f32 %v2583_v53, %v3026_v45 }
 0x63a   :  { %v1075_v60 = vcombine.low %v1056_v51, %v1058_v56  ;;  %v1076_v61 = vcombine.high %v1056_v51, %v1058_v56 }
 0x63b   :  { %v2585_v57 = vpop.eup %2584 }
 0x63c   :  { %v1057_v63 = vmul.f32 %v2585_v57, %v3030_v54  ;;  %v1083_v5 = vrot.slane %v1075_v60, %v2794_v52  ;;  %v1090_v6 = vrot.slane %v1076_v61, %v2794_v52 }
 0x63e   :  { %v1059_v0 = vcombine.low %v1055_v59, %v1057_v63  ;;  %v1060_v3 = vcombine.high %v1055_v59, %v1057_v63 }
 0x640   :  { %v1067_v7 = vrot.slane %v1059_v0, %v2794_v52  ;;  %v1074_v46 = vrot.slane %v1060_v3, %v2794_v52 }
 0x642   :  { %v1091_v36 = vcombine.low %v1067_v7, %v1083_v5  ;;  %v1092_v26 = vcombine.high %v1067_v7, %v1083_v5  ;;  %v1107_v55 = vcombine.low %v1074_v46, %v1090_v6  ;;  %v1108_v8 = vcombine.high %v1074_v46, %v1090_v6 }
 0x644   :  { %v1099_v45 = vrot.slane %v1091_v36, %v2798_v58  ;;  %v1106_v27 = vrot.slane %v1092_v26, %v2798_v58  ;;  %v1115_v54 = vrot.slane %v1107_v55, %v2798_v58  ;;  %v1122_v9 = vrot.slane %v1108_v8, %v2798_v58 }
 0x646   :  { %v1127_v14 = vcombine.low %v1099_v45, %v1106_v27  ;;  %v2346_v15 = vcombine.high %v1099_v45, %v1106_v27  ;;  %v1143_v17 = vcombine.low %v1115_v54, %v1122_v9  ;;  %v2347_v18 = vcombine.high %v1115_v54, %v1122_v9 }
 0x648   :  { %v3108_v19 = vrot.slane %v1127_v14, %v2794_v52  ;;  %v3111_v28 = vrot.slane %v2346_v15, %v2794_v52  ;;  %v3114_v29 = vrot.slane %v1143_v17, %v2794_v52  ;;  %v3117_v20 = vrot.slane %v2347_v18, %v2794_v52 }
 0x64a   :  { %v1159_v21 = vcombine.low %v3108_v19, %v3111_v28  ;;  %v1175_v22 = vcombine.low %v3114_v29, %v3117_v20  ;;  %v1160_v54 = vcombine.high %v3108_v19, %v3111_v28  ;;  %v1176_v9 = vcombine.high %v3114_v29, %v3117_v20 }
 0x64c   :  { %v3124_v49 = vrot.slane %v1159_v21, %v2798_v58  ;;  %v3127_v44 = vrot.slane %v1175_v22, %v2798_v58  ;;  %v2556_v21 = vld [vmem:[#allocation7 + $0x8] sm:$0xff]   ;;  %v1190_v19 = vrot.slane %v1176_v9, %v2798_v58 }
 0x64d   :  { %2515 = vmatpush3.bf16.msra.mxu1 %v2556_v21 }
 0x64e   :  { %v1191_v23 = vcombine.low %v3124_v49, %v3127_v44  ;;  %2516 = vmatprep.subr.bf16.mxu1 %v2685_v16 }
 0x689   :  { %v1876_v40 = vpop.xlane.xlu0 %1875 }
 0x68a   :  { %v1879_v37 = vpop.xlane.xlu1 %1878  ;;  %2586 = vrcp.f32 %v1876_v40 }
 0x68b   :  { %2588 = vrcp.f32 %v1879_v37 }
 0x697   :  { %v2587_v34 = vpop.eup %2586 }
 0x698   :  { %v2589_v41 = vpop.eup %2588 }
 0x6be   :  { %v1882_v38 = vpop.xlane.xlu0 %1881 }
 0x6bf   :  { %v1885_v39 = vpop.xlane.xlu1 %1884  ;;  %2590 = vrcp.f32 %v1882_v38 }
 0x6c0   :  { %2592 = vrcp.f32 %v1885_v39  ;;  %v1192_v39 = vcombine.high %v3124_v49, %v3127_v44  ;;  %v2364_v49 = vld [vmem:[%s3179_s6] ss:$0 sm:$0xff] }
 0x6ca   :  { %v1930_v24 = vpop.f32.mrf.mxu1  ;;  %v1976_v4 = vpop.f32.mrf.mxu0 }
 0x6cb   :  { %v2078_v43 = vmul.f32 %v2587_v34, %v1930_v24  ;;  %v2079_v10 = vmul.f32 %v2589_v41, %v1976_v4 }
 0x6cc   :  { %v2494_v30 = vpop.f32.mrf.mxu1  ;;  %v2500_v31 = vpop.f32.mrf.mxu0 }
 0x6cd   :  { %v2591_v62 = vpop.eup %2590  ;;  %v1174_v31 = vrot.slane %v1160_v54, %v2798_v58 }
 0x6ce   :  { %v1933_v32 = vpop.f32.mrf.mxu1  ;;  %v1979_v25 = vpop.f32.mrf.mxu0 }
 0x6cf   :  { %v2593_v42 = vpop.eup %2592  ;;  %v1193_v37 = vcombine.low %v1174_v31, %v1190_v19 }
 0x6d0   :  { %v2495_v33 = vpop.f32.mrf.mxu1  ;;  %v2501_v35 = vpop.f32.mrf.mxu0 }
 0x6f6   :  { %v2022_v11 = vpop.f32.mrf.mxu1 }
 0x6f7   :  { %v2080_v47 = vmul.f32 %v2591_v62, %v2022_v11  ;;  %v2068_v48 = vpop.f32.mrf.mxu0 }
 0x6f8   :  { %v2081_v13 = vmul.f32 %v2593_v42, %v2068_v48  ;;  %v2506_v12 = vpop.f32.mrf.mxu1  ;;  %v1194_v42 = vcombine.high %v1174_v31, %v1190_v19 }
 0x6f9   :  { %v2082_v50 = vcombine.low %v2078_v43, %v2080_v47  ;;  %v2083_v51 = vcombine.high %v2078_v43, %v2080_v47  ;;  %v2512_v53 = vpop.f32.mrf.mxu0 }
 0x6fa   :  { %v2098_v56 = vcombine.low %v2079_v10, %v2081_v13  ;;  %v2099_v57 = vcombine.high %v2079_v10, %v2081_v13  ;;  %v2025_v59 = vpop.f32.mrf.mxu1 }
 0x6fb   :  { %v2090_v60 = vrot.slane %v2082_v50, %v2794_v52  ;;  %v2097_v61 = vrot.slane %v2083_v51, %v2794_v52  ;;  %v2071_v63 = vpop.f32.mrf.mxu0 }
 0x6fc   :  { %v2106_v0 = vrot.slane %v2098_v56, %v2794_v52  ;;  %v2113_v3 = vrot.slane %v2099_v57, %v2794_v52  ;;  %v2507_v5 = vpop.f32.mrf.mxu1 }
 0x6fd   :  { %v2513_v6 = vpop.f32.mrf.mxu0 }
 0x6fe   :  { %v2114_v7 = vcombine.low %v2090_v60, %v2106_v0  ;;  %v2115_v46 = vcombine.high %v2090_v60, %v2106_v0  ;;  %v2130_v36 = vcombine.low %v2097_v61, %v2113_v3  ;;  %v2131_v26 = vcombine.high %v2097_v61, %v2113_v3 }
 0x700   :  { %v2122_v55 = vrot.slane %v2114_v7, %v2798_v58  ;;  %v2129_v8 = vrot.slane %v2115_v46, %v2798_v58  ;;  %v2138_v45 = vrot.slane %v2130_v36, %v2798_v58  ;;  %v2145_v27 = vrot.slane %v2131_v26, %v2798_v58 }
 0x702   :  { %v2150_v14 = vcombine.low %v2122_v55, %v2129_v8  ;;  %v2362_v15 = vcombine.high %v2122_v55, %v2129_v8  ;;  %v2166_v17 = vcombine.low %v2138_v45, %v2145_v27  ;;  %v2363_v18 = vcombine.high %v2138_v45, %v2145_v27 }
 0x704   :  { %v2157_v22 = vrot.slane %v2150_v14, %v2794_v52  ;;  %v2165_v24 = vrot.slane %v2362_v15, %v2794_v52  ;;  %v2173_v4 = vrot.slane %v2166_v17, %v2794_v52  ;;  %v2181_v30 = vrot.slane %v2363_v18, %v2794_v52  ;;  %v2557_v52 = vld [vmem:[#allocation7] sm:$0xff]  }
 0x705   :  { %2517 = vmatpush3.bf16.msra.mxu1 %v2557_v52 }
 0x706   :  { %v2183_v28 = vcombine.high %v2157_v22, %v2165_v24  ;;  %v2199_v29 = vcombine.high %v2173_v4, %v2181_v30  ;;  %v2182_v20 = vcombine.low %v2157_v22, %v2165_v24  ;;  %v2198_v32 = vcombine.low %v2173_v4, %v2181_v30 }
 0x708   :  { %v2197_v25 = vrot.slane %v2183_v28, %v2798_v58  ;;  %v2213_v33 = vrot.slane %v2199_v29, %v2798_v58  ;;  %v2190_v35 = vrot.slane %v2182_v20, %v2798_v58  ;;  %v2206_v40 = vrot.slane %v2198_v32, %v2798_v58 }
 0x70a   :  { %v2216_v38 = vcombine.low %v2197_v25, %v2213_v33  ;;  %v2215_v34 = vcombine.high %v2190_v35, %v2206_v40  ;;  %v2214_v41 = vcombine.low %v2190_v35, %v2206_v40  ;;  %v2217_v16 = vcombine.high %v2197_v25, %v2213_v33 }
 0x70c   :  { %v2544_v62 = vpack.i.bf16 %v2216_v38, %v1193_v37  ;;  %v2539_v11 = vpack.i.bf16 %v2215_v34, %v1192_v39  ;;  %v2549_v43 = vpack.i.bf16 %v2217_v16, %v1194_v42 }
 0x70e   :  { %2545 = vrot.lane.b32.xlu1 %v2544_v62, %s2693_s4  ;;  %2540 = vrot.lane.b32.xlu0 %v2539_v11, %s2694_s23 }
 0x712   :  { %2550 = vrot.lane.b32.xlu1 %v2549_v43, %s2695_s24 }
 0x780   :  { %v2546_v58 = vpop.permute.xlu1 %2545  ;;  %v2541_v47 = vpop.permute.xlu0 %2540 }
 0x781   :  { %v2543_v48 = vunpack.i.h.bf16 %v2541_v47  ;;  %v2542_v10 = vunpack.i.l.bf16 %v2541_v47  ;;  %v2548_v13 = vunpack.i.h.bf16 %v2546_v58  ;;  %v2547_v12 = vunpack.i.l.bf16 %v2546_v58 }
 0x783   :  { %v1207_v50 = vsel %vm641_vm2, %v1191_v23, %v2542_v10  ;;  %v2230_v51 = vsel %vm641_vm2, %v2214_v41, %v2543_v48 }
 0x784   :  { %v2551_v53 = vpop.permute.xlu1 %2550  ;;  %v1209_v59 = vsel %vm1208_vm4, %v1207_v50, %v2547_v12  ;;  %v2231_v60 = vsel %vm1208_vm4, %v2230_v51, %v2548_v13 }
 0x785   :  { %v2553_v56 = vunpack.i.h.bf16 %v2551_v53  ;;  %v2552_v57 = vunpack.i.l.bf16 %v2551_v53 }
 0x787   :  { %v1211_v61 = vsel %vm1210_vm5, %v1209_v59, %v2552_v57  ;;  %v2232_v63 = vsel %vm1210_vm5, %v2231_v60, %v2553_v56 }
 0x788   :  { %v2233_v0 = vpack.c.bf16 %v2232_v63, %v1211_v61 }
 0x78a   :  { %2519 = vmatmul.mubr.msk.bf16.vlgmr.msra.gmra.mxu1 %vm75_vm0, %v2233_v0 }
 0x84a   :  { %v2294_v44 = vpop.f32.mrf.mxu1 }
 0x84b   :  { %v2295_v23 = vadd.f32 %v2364_v49, %v2294_v44 }
 0x84c   :  { %v2520_v3 = vpop.f32.mrf.mxu1 }
 0x84d   :  { %v2301_v5 = vadd.f32 %v2755_v1, %v2295_v23 }
 0x84e   :  { %v2297_v6 = vpop.f32.mrf.mxu1 }
 0x84f   :  { %v2303_v7 = vpack.c.bf16 %v2301_v5, %v2301_v5  ;;  %v2298_v46 = vadd.f32 %v2364_v49, %v2297_v6 }
 0x850   :  { %v2521_v36 = vpop.f32.mrf.mxu1 }
 0x851   :  { %v2302_v26 = vadd.f32 %v2757_v2, %v2298_v46  ;;  %2306 = vst.msk [vmem:[#allocation8] sm:$0xf] %vm2305_vm6, %v2303_v7 }
 0x853   :  { %v2304_v55 = vpack.c.bf16 %v2302_v26, %v2302_v26 }
 0x855   :  { %2307 = vst.msk [vmem:[#allocation8 + $0x4] sm:$0xf] %vm2305_vm6, %v2304_v55 }
 0x856   :  { %2665 = shalt.err (!%p2662_p5)
}
 0x857   :  { %2319 = dma.vmem_to_hbm [thread:$0]  %s2314_s28, 128, %s3180_s7, [#allocation4], %s2682_s29, %s2682_s29, %s2683_s30  }
 0x858   :  { %2678 = dma.done.wait [#allocation4], 128  }
 0x859   :  { %2679 = vsyncadd [#allocation4], 4294967168 }
 0x85a   :  { %2323 = vsyncpa [#allocation3], 1 }
 0x85b   :  { %2324 = vsyncpa [#allocation6], 1 }
 0x85c   :  { %2325 = vsyncpa [#allocation4], 1 }

</bundles_post_ra>
